<compile_context>
chip_gen: v5e
topology: v5e:2x2
jax: 0.10.0
libtpu: 0.0.40
codegen_flags: <defaults>
</compile_context>

<pallas_src>
import functools

import jax
import jax.numpy as jnp
from jax.experimental import pallas as pl
from jax.experimental.pallas import tpu as pltpu

LANES = 128                          # vreg lane width
SUBLANES = 8                         # vreg sublane depth
ACC_ROWS_MAX = 32                    # 4 independent vreg-row accumulators
_TARGET_TILE_BYTES = 8 * 1024 * 1024 # per-tile DMA size (double-buffered)
_SMALL_BYTES = 32 * 1024             # below this, plain JAX is effectively free
_VMEM_LIMIT_BYTES = 32 * 1024 * 1024 # 2 x 8 MiB in-buffers + slack; < 64 MiB v7x
_NUM_CORE_SPLITS = 2                 # v7x has 2 TensorCores; harmless elsewhere


def _sumsq_ref(x):
    """Plain-JAX fallback for tiny inputs / ragged tails."""
    return jnp.sum(jnp.square(x.astype(jnp.float32)))


def _choose_row_tile(rows, d, itemsize, tile_bytes):
    """Power-of-two row count per tile: biggest tile <= tile_bytes (and <= rows)."""
    target_rows = max(SUBLANES, tile_bytes // (d * itemsize))
    cap = min(target_rows, rows)
    rt = SUBLANES
    while rt * 2 <= cap:
        rt *= 2
    return rt


def _sumsq_kernel(x_ref, o_ref, *, tiles_per_core, n_tiles, guard):
    """Accumulate a (1, ACC_ROWS, D) f32 sum-of-squares partial per core.

    Hot loop is VPU-only (square + vreg adds); the tiny cross-lane reduce,
    sqrt and divide happen in the plain-JAX epilogue.
    """
    c = pl.program_id(0)   # core split (parallel)
    i = pl.program_id(1)   # tile index within this core's range (arbitrary)

    @pl.when(i == 0)
    def _():
        o_ref[...] = jnp.zeros_like(o_ref)

    def accumulate():
        x = x_ref[...].astype(jnp.float32)          # accumulate in f32
        xx = x * x
        acc_rows, d = o_ref.shape[1], o_ref.shape[2]
        # (row_tile, d) -> (row_tile/acc_rows, acc_rows, d); the leading-axis
        # sum is pure VPU adds spread over acc_rows/8 independent vreg rows,
        # so there is no single long dependent add chain.
        partial = xx.reshape(-1, acc_rows, d).sum(axis=0)
        o_ref[...] += partial[None]

    if guard:
        # Odd tile count: the last core's overhang step re-reads a valid tile
        # (clamped index_map) but must not accumulate it a second time.
        @pl.when(c * tiles_per_core + i < n_tiles)
        def _():
            accumulate()
    else:
        accumulate()


def _sumsq_pallas(x, row_tile):
    """Sum of squares of the first n_tiles*row_tile rows via Pallas, tail in JAX."""
    rows, d = x.shape
    itemsize = x.dtype.itemsize
    n_tiles = rows // row_tile

    num_splits = _NUM_CORE_SPLITS if n_tiles >= _NUM_CORE_SPLITS else 1
    tiles_per_core = -(-n_tiles // num_splits)       # ceil
    guard = (num_splits * tiles_per_core != n_tiles)
    acc_rows = min(ACC_ROWS_MAX, row_tile)

    if guard:
        def in_map(c, i):
            return (jnp.minimum(c * tiles_per_core + i, n_tiles - 1), 0)
    else:
        def in_map(c, i):
            return (c * tiles_per_core + i, 0)

    covered_elems = n_tiles * row_tile * d
    out_bytes = num_splits * acc_rows * d * 4

    kernel = functools.partial(_sumsq_kernel, tiles_per_core=tiles_per_core,
                               n_tiles=n_tiles, guard=guard)
    partials = pl.pallas_call(
        kernel,
        out_shape=jax.ShapeDtypeStruct((num_splits, acc_rows, d), jnp.float32),
        grid=(num_splits, tiles_per_core),
        in_specs=[pl.BlockSpec((row_tile, d), in_map)],
        out_specs=pl.BlockSpec((1, acc_rows, d), lambda c, i: (c, 0, 0)),
        compiler_params=pltpu.CompilerParams(
            dimension_semantics=("parallel", "arbitrary"),
            vmem_limit_bytes=_VMEM_LIMIT_BYTES,
        ),
        cost_estimate=pl.CostEstimate(
            flops=2 * covered_elems,
            transcendentals=0,
            bytes_accessed=covered_elems * itemsize + out_bytes,
        ),
    )(x)

    sumsq = jnp.sum(partials)                        # tiny epilogue reduce
    covered_rows = n_tiles * row_tile
    if covered_rows < rows:                          # ragged tail (< one tile)
        sumsq = sumsq + _sumsq_ref(x[covered_rows:])
    return sumsq


def _sumsq(emb, tile_bytes):
    """Sum of squares of all elements of one embedding tensor."""
    if emb.ndim == 0:
        return _sumsq_ref(emb)
    if emb.ndim == 1:
        # TODO(synk): large 1-D inputs could be kernelized via a free (-1,128)
        # reshape of the 128-aligned prefix; plain JAX for now.
        return _sumsq_ref(emb)

    x = emb.reshape(-1, emb.shape[-1]) if emb.ndim > 2 else emb  # free flatten
    rows, d = x.shape
    itemsize = x.dtype.itemsize
    n = rows * d

    if n * itemsize < _SMALL_BYTES:                  # tiny table: JAX is free
        return _sumsq_ref(x)

    # Opportunistic lane-dense repack: a flat reshape of a contiguous array is
    # a bitcast (no HBM copy) and (., 128) tiles make DMA + vregs fully dense
    # for small embedding dims.
    if d % LANES != 0 and n % LANES == 0:
        x = x.reshape(n // LANES, LANES)
        rows, d = x.shape

    row_tile = _choose_row_tile(rows, d, itemsize, tile_bytes)
    if rows // row_tile == 0:
        return _sumsq_ref(x)
    if 2 * row_tile * d * itemsize > _VMEM_LIMIT_BYTES - (1 << 20):
        return _sumsq_ref(x)                         # pathological aspect ratio
    return _sumsq_pallas(x, row_tile)


def emb_loss(*embeddings, norm=2, tile_bytes=_TARGET_TILE_BYTES):
    """Pallas-backed EmbLoss.forward: sum_i ||emb_i||_2 / emb_i.shape[0]."""
    # TODO(synk): only p=2 (the torch.norm default) is implemented; other
    # p-norms would need |x|^p accumulation and a p-th root.
    assert norm == 2, "only p=2 (the torch.norm default) is implemented"
    assert len(embeddings) >= 1
    loss = jnp.float32(0.0)
    for emb in embeddings:
        emb = jnp.asarray(emb)
        sumsq = _sumsq(emb, tile_bytes)
        loss = loss + jnp.sqrt(sumsq) / emb.shape[0]
    return loss


if __name__ == "__main__":
    key = jax.random.PRNGKey(0)
    k1, k2, k3 = jax.random.split(key, 3)

    # Embedding tables as regularized by EmbLoss: (num_entities, dim).
    user_emb = jax.random.normal(k1, (2067, 64), dtype=jnp.float32)
    item_emb = jax.random.normal(k2, (1300, 64), dtype=jnp.float32)
    ctx_emb = jax.random.normal(k3, (96, 48), dtype=jnp.float32)

    # Reference: same math as torch.norm(p=2) / shape[0], summed.
    ref = sum(jnp.linalg.norm(e.ravel()) / e.shape[0]
              for e in (user_emb, item_emb, ctx_emb))

    # Default (perf) configuration: ~8 MiB tiles -> one tile per table here.
    loss = jax.block_until_ready(emb_loss(user_emb, item_emb, ctx_emb))
    assert jnp.allclose(loss, ref, rtol=1e-5, atol=1e-5), (loss, ref)

    # Small-tile configuration: exercises multi-tile accumulation, the 2-way
    # core split (including the clamped odd-tile-count path) and the plain-JAX
    # ragged-tail path on the same inputs.
    loss_small = jax.block_until_ready(
        emb_loss(user_emb, item_emb, ctx_emb, tile_bytes=64 * 1024))
    assert jnp.allclose(loss_small, ref, rtol=1e-5, atol=1e-5), (loss_small, ref)

    print("KERNEL_OK")
</pallas_src>

<mosaic_0001>
module attributes {stable_mosaic.version = 11 : i64} {
  func.func @_sumsq_kernel(%arg0: i32, %arg1: i32, %arg2: memref<2048x64xf32, #tpu.memory_space<vmem>>, %arg3: memref<1x32x64xf32, #tpu.memory_space<vmem>>) attributes {dimension_semantics = [#tpu.dimension_semantics<parallel>, #tpu.dimension_semantics<arbitrary>], iteration_bounds = array<i64: 1, 1>, scalar_prefetch = 0 : i64, scratch_operands = 0 : i64, tpu.core_type = #tpu.core_type<tc>, window_params = [{transform_indices = @transform_0, window_bounds = array<i64: 2048, 64>}, {transform_indices = @transform_1, window_bounds = array<i64: 1, 32, 64>}]} {
    %c0_i32 = arith.constant 0 : i32
    %0 = arith.cmpi eq, %arg1, %c0_i32 : i32
    %1 = arith.extui %0 : i1 to i32
    %c0_i32_0 = arith.constant 0 : i32
    %2 = arith.cmpi ne, %1, %c0_i32_0 : i32
    scf.if %2 {
      %cst_8 = arith.constant 0.000000e+00 : f32
      %11 = vector.broadcast %cst_8 : f32 to vector<1x32x64xf32>
      %c0_9 = arith.constant 0 : index
      %c0_10 = arith.constant 0 : index
      %c0_11 = arith.constant 0 : index
      %12 = vector.load %arg3[%c0_9, %c0_10, %c0_11] : memref<1x32x64xf32, #tpu.memory_space<vmem>>, vector<1x32x64xf32>
      tpu.vector_store %arg3[%c0_9, %c0_10, %c0_11], %11 {strides = array<i32>} : memref<1x32x64xf32, #tpu.memory_space<vmem>>, vector<1x32x64xf32>,
    } else {
    }
    %c0 = arith.constant 0 : index
    %c0_1 = arith.constant 0 : index
    %3 = vector.load %arg2[%c0, %c0_1] : memref<2048x64xf32, #tpu.memory_space<vmem>>, vector<2048x64xf32>
    %4 = arith.mulf %3, %3 : vector<2048x64xf32>
    %5 = vector.shape_cast %4 : vector<2048x64xf32> to vector<64x32x64xf32>
    %cst = arith.constant dense<0.000000e+00> : vector<32x64xf32>
    %6 = vector.multi_reduction <add>, %5, %cst [0] : vector<64x32x64xf32> to vector<32x64xf32>
    %c0_2 = arith.constant 0 : index
    %c0_3 = arith.constant 0 : index
    %c0_4 = arith.constant 0 : index
    %7 = vector.load %arg3[%c0_2, %c0_3, %c0_4] : memref<1x32x64xf32, #tpu.memory_space<vmem>>, vector<1x32x64xf32>
    %8 = vector.shape_cast %6 : vector<32x64xf32> to vector<1x32x64xf32>
    %9 = arith.addf %7, %8 : vector<1x32x64xf32>
    %c0_5 = arith.constant 0 : index
    %c0_6 = arith.constant 0 : index
    %c0_7 = arith.constant 0 : index
    %10 = vector.load %arg3[%c0_5, %c0_6, %c0_7] : memref<1x32x64xf32, #tpu.memory_space<vmem>>, vector<1x32x64xf32>
    tpu.vector_store %arg3[%c0_5, %c0_6, %c0_7], %9 {strides = array<i32>} : memref<1x32x64xf32, #tpu.memory_space<vmem>>, vector<1x32x64xf32>,
    return
  }
  func.func @transform_0(%arg0: i32, %arg1: i32) -> (i32, i32) {
    %c1_i32 = arith.constant 1 : i32
    %0 = arith.muli %arg0, %c1_i32 : i32
    %1 = arith.addi %0, %arg1 : i32
    %c0_i32 = arith.constant 0 : i32
    %c0_i32_0 = arith.constant 0 : i32
    return %1, %c0_i32 : i32, i32
  }
  func.func @transform_1(%arg0: i32, %arg1: i32) -> (i32, i32, i32) {
    %c0_i32 = arith.constant 0 : i32
    %c0_i32_0 = arith.constant 0 : i32
    %c0_i32_1 = arith.constant 0 : i32
    return %arg0, %c0_i32, %c0_i32_0 : i32, i32, i32
  }
}

</mosaic_0001>

<bundles_post_ra>
// kernel: tpu_custom_call.1
= control target key start
LH: loop header
LB: loop body
LE: loop exit
PB: predicated region body
PF: predicated region fallthrough
CT: control target
= control target key end

     0   :  { %6 = vsyncpa [#allocation3], 0  ;;  %vm55_vm0 = vcmask 523264   ;;  %v1147_v1 = vmov 0.0   ;;  %s1148_s25 = smov [#allocation2]   ;;  %s1149_s29 = smov 128   ;;  %s2730_s0 = inlined_call_operand.vmem [shape: f32[2067,64], index: 0, kind: input, shape index: {}]   ;;  %s2731_s1 = inlined_call_operand.hbm [shape: f32[1,32,64], index: 1, kind: output, shape index: {}]  }
   0x1   :  { %v60_v0 = vld [vmem:[%s2730_s0] sm:$0xff]  ;;  %56 = vst.msk [vmem:[#allocation2] sm:$0xff] %vm55_vm0, %v1147_v1  ;;  %s1097_s26 = sshll.u32 %s1148_s25, 4  ;;  %s1099_s28 = sshll.u32 %s2731_s1, 4  ;;  %s1098_s26 = int_to_ptr.vmem [resolvable:$true] %s1097_s26  ;;  %s1100_s28 = int_to_ptr.hbm [resolvable:$true] %s1099_s28 }
   0x2   :  { %v64_v2 = vld [vmem:[%s2730_s0 + $0x20] sm:$0xff]  ;;  %v316_v3 = vmul.f32 %v60_v0, %v60_v0  ;;  %57 = vst.msk [vmem:[#allocation2 + $0x8] sm:$0xff] %vm55_vm0, %v1147_v1  ;;  %s1150_s30 = smov 8  }
   0x3   :  { %v320_v4 = vmul.f32 %v64_v2, %v64_v2  ;;  %58 = vst.msk [vmem:[#allocation2 + $0x10] sm:$0xff] %vm55_vm0, %v1147_v1  ;;  %v68_v5 = vld [vmem:[%s2730_s0 + $0x40] sm:$0xff] }
   0x4   :  { %v573_v6 = vsel %vm55_vm0, %v316_v3, 0.0  ;;  %59 = vst.msk [vmem:[#allocation2 + $0x18] sm:$0xff] %vm55_vm0, %v1147_v1  ;;  %v72_v7 = vld [vmem:[%s2730_s0 + $0x60] sm:$0xff]  ;;  %v324_v8 = vmul.f32 %v68_v5, %v68_v5 }
   0x5   :  { %v574_v9 = vsel %vm55_vm0, %v320_v4, 0.0  ;;  %v76_v10 = vld [vmem:[%s2730_s0 + $0x80] sm:$0xff]  ;;  %v328_v11 = vmul.f32 %v72_v7, %v72_v7 }
   0x6   :  { %v575_v12 = vadd.f32 %v574_v9, %v573_v6  ;;  %v332_v13 = vmul.f32 %v76_v10, %v76_v10  ;;  %v576_v14 = vsel %vm55_vm0, %v324_v8, 0.0  ;;  %v80_v15 = vld [vmem:[%s2730_s0 + $0xa0] sm:$0xff] }
   0x7   :  { %v84_v17 = vld [vmem:[%s2730_s0 + $0xc0] sm:$0xff]  ;;  %v336_v18 = vmul.f32 %v80_v15, %v80_v15  ;;  %v578_v19 = vsel %vm55_vm0, %v328_v11, 0.0 }
   0x8   :  { %v577_v16 = vadd.f32 %v576_v14, %v575_v12  ;;  %v88_v20 = vld [vmem:[%s2730_s0 + $0xe0] sm:$0xff]  ;;  %v340_v22 = vmul.f32 %v84_v17, %v84_v17  ;;  %v580_v23 = vsel %vm55_vm0, %v332_v13, 0.0 }
   0x9   :  { %v92_v24 = vld [vmem:[%s2730_s0 + $0x100] sm:$0xff]  ;;  %v344_v26 = vmul.f32 %v88_v20, %v88_v20  ;;  %v582_v27 = vsel %vm55_vm0, %v336_v18, 0.0 }
   0xa   :  { %v579_v21 = vadd.f32 %v578_v19, %v577_v16  ;;  %v96_v28 = vld [vmem:[%s2730_s0 + $0x120] sm:$0xff]  ;;  %v348_v30 = vmul.f32 %v92_v24, %v92_v24  ;;  %v584_v31 = vsel %vm55_vm0, %v340_v22, 0.0 }
   0xb   :  { %v100_v32 = vld [vmem:[%s2730_s0 + $0x140] sm:$0xff]  ;;  %v352_v34 = vmul.f32 %v96_v28, %v96_v28  ;;  %v586_v35 = vsel %vm55_vm0, %v344_v26, 0.0 }
   0xc   :  { %v581_v25 = vadd.f32 %v580_v23, %v579_v21  ;;  %v104_v36 = vld [vmem:[%s2730_s0 + $0x160] sm:$0xff]  ;;  %v356_v38 = vmul.f32 %v100_v32, %v100_v32  ;;  %v588_v39 = vsel %vm55_vm0, %v348_v30, 0.0 }
   0xd   :  { %v108_v40 = vld [vmem:[%s2730_s0 + $0x180] sm:$0xff]  ;;  %v360_v42 = vmul.f32 %v104_v36, %v104_v36  ;;  %v590_v43 = vsel %vm55_vm0, %v352_v34, 0.0 }
   0xe   :  { %v583_v29 = vadd.f32 %v582_v27, %v581_v25  ;;  %v112_v44 = vld [vmem:[%s2730_s0 + $0x1a0] sm:$0xff]  ;;  %v364_v46 = vmul.f32 %v108_v40, %v108_v40  ;;  %v592_v47 = vsel %vm55_vm0, %v356_v38, 0.0  ;;  %v61_v38 = vld [vmem:[%s2730_s0 + $0x8] sm:$0xff] }
   0xf   :  { %v116_v48 = vld [vmem:[%s2730_s0 + $0x1c0] sm:$0xff]  ;;  %v368_v50 = vmul.f32 %v112_v44, %v112_v44  ;;  %v594_v51 = vsel %vm55_vm0, %v360_v42, 0.0  ;;  %v63_v42 = vld [vmem:[%s2730_s0 + $0x18] sm:$0xff] }
  0x10   :  { %v585_v33 = vadd.f32 %v584_v31, %v583_v29  ;;  %v120_v52 = vld [vmem:[%s2730_s0 + $0x1e0] sm:$0xff]  ;;  %v372_v54 = vmul.f32 %v116_v48, %v116_v48  ;;  %v596_v55 = vsel %vm55_vm0, %v364_v46, 0.0  ;;  %v67_v46 = vld [vmem:[%s2730_s0 + $0x38] sm:$0xff]  ;;  %v70_v48 = vld [vmem:[%s2730_s0 + $0x50] sm:$0xff] }
  0x11   :  { %v124_v56 = vld [vmem:[%s2730_s0 + $0x200] sm:$0xff]  ;;  %v376_v58 = vmul.f32 %v120_v52, %v120_v52  ;;  %v598_v59 = vsel %vm55_vm0, %v368_v50, 0.0  ;;  %v73_v52 = vld [vmem:[%s2730_s0 + $0x68] sm:$0xff] }
  0x12   :  { %v587_v37 = vadd.f32 %v586_v35, %v585_v33  ;;  %v128_v60 = vld [vmem:[%s2730_s0 + $0x220] sm:$0xff]  ;;  %v380_v62 = vmul.f32 %v124_v56, %v124_v56  ;;  %v600_v63 = vsel %vm55_vm0, %v372_v54, 0.0  ;;  %v75_v56 = vld [vmem:[%s2730_s0 + $0x78] sm:$0xff] }
  0x13   :  { %v132_v0 = vld [vmem:[%s2730_s0 + $0x240] sm:$0xff]  ;;  %v384_v2 = vmul.f32 %v128_v60, %v128_v60  ;;  %v602_v3 = vsel %vm55_vm0, %v376_v58, 0.0  ;;  %v78_v58 = vld [vmem:[%s2730_s0 + $0x90] sm:$0xff]  ;;  %v79_v60 = vld [vmem:[%s2730_s0 + $0x98] sm:$0xff] }
  0x14   :  { %v589_v41 = vadd.f32 %v588_v39, %v587_v37  ;;  %v136_v4 = vld [vmem:[%s2730_s0 + $0x260] sm:$0xff]  ;;  %v388_v6 = vmul.f32 %v132_v0, %v132_v0  ;;  %v604_v7 = vsel %vm55_vm0, %v380_v62, 0.0  ;;  %v82_v62 = vld [vmem:[%s2730_s0 + $0xb0] sm:$0xff] }
  0x15   :  { %v140_v8 = vld [vmem:[%s2730_s0 + $0x280] sm:$0xff]  ;;  %v392_v10 = vmul.f32 %v136_v4, %v136_v4  ;;  %v606_v11 = vsel %vm55_vm0, %v384_v2, 0.0  ;;  %v83_v2 = vld [vmem:[%s2730_s0 + $0xb8] sm:$0xff]  ;;  %v86_v4 = vld [vmem:[%s2730_s0 + $0xd0] sm:$0xff] }
  0x16   :  { %v591_v45 = vadd.f32 %v590_v43, %v589_v41  ;;  %v144_v12 = vld [vmem:[%s2730_s0 + $0x2a0] sm:$0xff]  ;;  %v396_v14 = vmul.f32 %v140_v8, %v140_v8  ;;  %v608_v15 = vsel %vm55_vm0, %v388_v6, 0.0  ;;  %v62_v41 = vld [vmem:[%s2730_s0 + $0x10] sm:$0xff]  ;;  %v65_v43 = vld [vmem:[%s2730_s0 + $0x28] sm:$0xff]  ;;  %v1346_v6 = vmul.f32 %v63_v42, %v63_v42 }
  0x17   :  { %v148_v16 = vld [vmem:[%s2730_s0 + $0x2c0] sm:$0xff]  ;;  %v400_v18 = vmul.f32 %v144_v12, %v144_v12  ;;  %v610_v19 = vsel %vm55_vm0, %v392_v10, 0.0  ;;  %v1332_v0 = vmul.f32 %v62_v41, %v62_v41  ;;  %v89_v10 = vld [vmem:[%s2730_s0 + $0xe8] sm:$0xff]  ;;  %v91_v12 = vld [vmem:[%s2730_s0 + $0xf8] sm:$0xff] }
  0x18   :  { %v593_v49 = vadd.f32 %v592_v47, %v591_v45  ;;  %v152_v20 = vld [vmem:[%s2730_s0 + $0x2e0] sm:$0xff]  ;;  %v404_v22 = vmul.f32 %v148_v16, %v148_v16  ;;  %v612_v23 = vsel %vm55_vm0, %v396_v14, 0.0  ;;  %v66_v45 = vld [vmem:[%s2730_s0 + $0x30] sm:$0xff]  ;;  %v69_v47 = vld [vmem:[%s2730_s0 + $0x48] sm:$0xff] }
  0x19   :  { %v156_v24 = vld [vmem:[%s2730_s0 + $0x300] sm:$0xff]  ;;  %v408_v26 = vmul.f32 %v152_v20, %v152_v20  ;;  %v614_v27 = vsel %vm55_vm0, %v400_v18, 0.0  ;;  %v1363_v14 = vmul.f32 %v66_v45, %v66_v45  ;;  %v1367_v16 = vmul.f32 %v69_v47, %v69_v47  ;;  %v93_v18 = vld [vmem:[%s2730_s0 + $0x108] sm:$0xff]  ;;  %v95_v20 = vld [vmem:[%s2730_s0 + $0x118] sm:$0xff] }
  0x1a   :  { %v595_v53 = vadd.f32 %v594_v51, %v593_v49  ;;  %v160_v28 = vld [vmem:[%s2730_s0 + $0x320] sm:$0xff]  ;;  %v412_v30 = vmul.f32 %v156_v24, %v156_v24  ;;  %v616_v31 = vsel %vm55_vm0, %v404_v22, 0.0  ;;  %v71_v51 = vld [vmem:[%s2730_s0 + $0x58] sm:$0xff]  ;;  %v1382_v22 = vmul.f32 %v73_v52, %v73_v52  ;;  %v109_v42 = vld [vmem:[%s2730_s0 + $0x188] sm:$0xff] }
  0x1b   :  { %v164_v32 = vld [vmem:[%s2730_s0 + $0x340] sm:$0xff]  ;;  %v416_v34 = vmul.f32 %v160_v28, %v160_v28  ;;  %v618_v35 = vsel %vm55_vm0, %v408_v26, 0.0  ;;  %v1386_v24 = vmul.f32 %v75_v56, %v75_v56  ;;  %v98_v26 = vld [vmem:[%s2730_s0 + $0x130] sm:$0xff]  ;;  %v107_v41 = vld [vmem:[%s2730_s0 + $0x178] sm:$0xff] }
  0x1c   :  { %v597_v57 = vadd.f32 %v596_v55, %v595_v53  ;;  %v168_v36 = vld [vmem:[%s2730_s0 + $0x360] sm:$0xff]  ;;  %v420_v39 = vmul.f32 %v164_v32, %v164_v32  ;;  %v620_v40 = vsel %vm55_vm0, %v412_v30, 0.0  ;;  %v74_v53 = vld [vmem:[%s2730_s0 + $0x70] sm:$0xff]  ;;  %v1401_v30 = vmul.f32 %v79_v60, %v79_v60  ;;  %v101_v32 = vld [vmem:[%s2730_s0 + $0x148] sm:$0xff] }
  0x1d   :  { %v424_v49 = vmul.f32 %v168_v36, %v168_v36  ;;  %v622_v50 = vsel %vm55_vm0, %v416_v34, 0.0  ;;  %v172_v54 = vld [vmem:[%s2730_s0 + $0x380] sm:$0xff]  ;;  %v103_v34 = vld [vmem:[%s2730_s0 + $0x158] sm:$0xff] }
  0x1e   :  { %v599_v61 = vadd.f32 %v598_v59, %v597_v57  ;;  %v77_v57 = vld [vmem:[%s2730_s0 + $0x88] sm:$0xff]  ;;  %v624_v59 = vsel %vm55_vm0, %v420_v39, 0.0  ;;  %v428_v8 = vmul.f32 %v172_v54, %v172_v54  ;;  %v1455_v54 = vmul.f32 %v93_v18, %v93_v18  ;;  %v115_v56 = vld [vmem:[%s2730_s0 + $0x1b8] sm:$0xff] }
  0x1f   :  { %v1397_v28 = vmul.f32 %v77_v57, %v77_v57  ;;  %v117_v57 = vld [vmem:[%s2730_s0 + $0x1c8] sm:$0xff]  ;;  %v1501_v18 = vmul.f32 %v101_v32, %v101_v32 }
  0x20   :  { %v601_v1 = vadd.f32 %v600_v63, %v599_v61  ;;  %v81_v61 = vld [vmem:[%s2730_s0 + $0xa8] sm:$0xff]  ;;  %v1330_v63 = vmul.f32 %v61_v38, %v61_v38  ;;  %v628_v39 = vsel %vm55_vm0, %v428_v8, 0.0 }
  0x21   :  { %v1415_v36 = vmul.f32 %v81_v61, %v81_v61 }
  0x22   :  { %v603_v5 = vadd.f32 %v602_v3, %v601_v1  ;;  %v85_v3 = vld [vmem:[%s2730_s0 + $0xc8] sm:$0xff] }
  0x23   :  { %v1434_v45 = vmul.f32 %v85_v3, %v85_v3  ;;  %v122_v3 = vld [vmem:[%s2730_s0 + $0x1f0] sm:$0xff] }
  0x24   :  { %v605_v9 = vadd.f32 %v604_v7, %v603_v5  ;;  %v87_v5 = vld [vmem:[%s2730_s0 + $0xd8] sm:$0xff]  ;;  %v1348_v7 = vmul.f32 %v65_v43, %v65_v43  ;;  %v180_v43 = vld [vmem:[%s2730_s0 + $0x3c0] sm:$0xff] }
  0x25   :  { %v1438_v47 = vmul.f32 %v87_v5, %v87_v5  ;;  %v436_v8 = vmul.f32 %v180_v43, %v180_v43  ;;  %v134_v43 = vld [vmem:[%s2730_s0 + $0x250] sm:$0xff] }
  0x26   :  { %v607_v13 = vadd.f32 %v606_v11, %v605_v9  ;;  %v626_v9 = vsel %vm55_vm0, %v424_v49, 0.0  ;;  %v90_v11 = vld [vmem:[%s2730_s0 + $0xf0] sm:$0xff]  ;;  %v111_v49 = vld [vmem:[%s2730_s0 + $0x198] sm:$0xff] }
  0x27   :  { %2733 = vst [vmem:[#allocation6_spill] sm:$0xff] %v1438_v47  ;;  %v1451_v52 = vmul.f32 %v90_v11, %v90_v11  ;;  %v125_v11 = vld [vmem:[%s2730_s0 + $0x208] sm:$0xff]  ;;  %v146_v47 = vld [vmem:[%s2730_s0 + $0x2b0] sm:$0xff] }
  0x28   :  { %v609_v17 = vadd.f32 %v608_v15, %v607_v13  ;;  %v176_v13 = vld [vmem:[%s2730_s0 + $0x3a0] sm:$0xff]  ;;  %v1365_v15 = vmul.f32 %v67_v46, %v67_v46  ;;  %v1436_v46 = vmul.f32 %v86_v4, %v86_v4  ;;  %v1484_v4 = vmul.f32 %v98_v26, %v98_v26  ;;  %v127_v26 = vld [vmem:[%s2730_s0 + $0x218] sm:$0xff] }
  0x29   :  { %v432_v38 = vmul.f32 %v176_v13, %v176_v13  ;;  %v184_v13 = vld [vmem:[%s2730_s0 + $0x3e0] sm:$0xff] }
  0x2a   :  { %v611_v21 = vadd.f32 %v610_v19, %v609_v17  ;;  %v1369_v17 = vmul.f32 %v70_v48, %v70_v48  ;;  %v94_v19 = vld [vmem:[%s2730_s0 + $0x110] sm:$0xff] }
  0x2b   :  { %v110_v48 = vld [vmem:[%s2730_s0 + $0x190] sm:$0xff] }
  0x2c   :  { %v613_v25 = vadd.f32 %v612_v23, %v611_v21  ;;  %v1380_v21 = vmul.f32 %v71_v51, %v71_v51  ;;  %v1384_v23 = vmul.f32 %v74_v53, %v74_v53  ;;  %v1449_v51 = vmul.f32 %v89_v10, %v89_v10  ;;  %v123_v10 = vld [vmem:[%s2730_s0 + $0x1f8] sm:$0xff] }
  0x2d   :  { %v1453_v53 = vmul.f32 %v91_v12, %v91_v12  ;;  %v126_v12 = vld [vmem:[%s2730_s0 + $0x210] sm:$0xff] }
  0x2e   :  { %v615_v29 = vadd.f32 %v614_v27, %v613_v25  ;;  %v97_v25 = vld [vmem:[%s2730_s0 + $0x128] sm:$0xff]  ;;  %v99_v27 = vld [vmem:[%s2730_s0 + $0x138] sm:$0xff] }
  0x2f   :  { %2734 = vst [vmem:[#allocation7_spill] sm:$0xff] %v1453_v53  ;;  %v1470_v60 = vmul.f32 %v97_v25, %v97_v25  ;;  %v1486_v5 = vmul.f32 %v99_v27, %v99_v27  ;;  %v129_v27 = vld [vmem:[%s2730_s0 + $0x228] sm:$0xff]  ;;  %v143_v53 = vld [vmem:[%s2730_s0 + $0x298] sm:$0xff] }
  0x30   :  { %v617_v33 = vadd.f32 %v616_v31, %v615_v29  ;;  %v1399_v29 = vmul.f32 %v78_v58, %v78_v58  ;;  %v1466_v58 = vmul.f32 %v94_v19, %v94_v19 }
  0x31   :  { %2736 = vst [vmem:[#allocation9_spill] sm:$0xff] %v1486_v5  ;;  %v138_v5 = vld [vmem:[%s2730_s0 + $0x270] sm:$0xff] }
  0x32   :  { %v619_v37 = vadd.f32 %v618_v35, %v617_v33  ;;  %v102_v33 = vld [vmem:[%s2730_s0 + $0x150] sm:$0xff]  ;;  %v105_v35 = vld [vmem:[%s2730_s0 + $0x168] sm:$0xff] }
  0x33   :  { %v1503_v19 = vmul.f32 %v102_v33, %v102_v33  ;;  %v1507_v25 = vmul.f32 %v105_v35, %v105_v35  ;;  %v1520_v33 = vmul.f32 %v107_v41, %v107_v41  ;;  %v1524_v35 = vmul.f32 %v110_v48, %v110_v48 }
  0x34   :  { %v621_v44 = vadd.f32 %v620_v40, %v619_v37  ;;  %v1417_v37 = vmul.f32 %v82_v62, %v82_v62  ;;  %v106_v40 = vld [vmem:[%s2730_s0 + $0x170] sm:$0xff] }
  0x35   :  { %v118_v62 = vld [vmem:[%s2730_s0 + $0x1d0] sm:$0xff]  ;;  %v1518_v32 = vmul.f32 %v106_v40, %v106_v40  ;;  %2738 = vst [vmem:[#allocation11_spill] sm:$0xff] %v1520_v33  ;;  %v1535_v40 = vmul.f32 %v111_v49, %v111_v49  ;;  %v135_v33 = vld [vmem:[%s2730_s0 + $0x258] sm:$0xff] }
  0x36   :  { %v623_v55 = vadd.f32 %v622_v50, %v621_v44  ;;  %v1432_v44 = vmul.f32 %v83_v2, %v83_v2  ;;  %v113_v50 = vld [vmem:[%s2730_s0 + $0x1a8] sm:$0xff]  ;;  %2739 = vst [vmem:[#allocation12_spill] sm:$0xff] %v1524_v35  ;;  %v139_v49 = vld [vmem:[%s2730_s0 + $0x278] sm:$0xff] }
  0x37   :  { %v121_v2 = vld [vmem:[%s2730_s0 + $0x1e8] sm:$0xff]  ;;  %2740 = vst [vmem:[#allocation13_spill] sm:$0xff] %v1535_v40  ;;  %v1537_v41 = vmul.f32 %v113_v50, %v113_v50  ;;  %v1553_v50 = vmul.f32 %v115_v56, %v115_v56  ;;  %v188_v56 = vld [vmem:[%s2730_s0 + $0x400] sm:$0xff]  ;;  %v147_v35 = vld [vmem:[%s2730_s0 + $0x2b8] sm:$0xff] }
  0x38   :  { %v625_v1 = vadd.f32 %v624_v59, %v623_v55  ;;  %2732 = vst [vmem:[#allocation5_spill] sm:$0xff] %v1432_v44  ;;  %v114_v55 = vld [vmem:[%s2730_s0 + $0x1b0] sm:$0xff]  ;;  %v1468_v59 = vmul.f32 %v95_v20, %v95_v20  ;;  %v1505_v20 = vmul.f32 %v103_v34, %v103_v34  ;;  %v1522_v34 = vmul.f32 %v109_v42, %v109_v42  ;;  %v141_v40 = vld [vmem:[%s2730_s0 + $0x288] sm:$0xff] }
  0x39   :  { %v1539_v42 = vmul.f32 %v114_v55, %v114_v55  ;;  %2742 = vst [vmem:[#allocation15_spill] sm:$0xff] %v1553_v50  ;;  %v1555_v55 = vmul.f32 %v117_v57, %v117_v57  ;;  %v1570_v57 = vmul.f32 %v118_v62, %v118_v62  ;;  %v1576_v50 = vmul.f32 %v122_v3, %v122_v3  ;;  %v165_v44 = vld [vmem:[%s2730_s0 + $0x348] sm:$0xff] }
  0x3a   :  { %v627_v31 = vadd.f32 %v626_v9, %v625_v1  ;;  %2735 = vst [vmem:[#allocation8_spill] sm:$0xff] %v1468_v59  ;;  %v119_v1 = vld [vmem:[%s2730_s0 + $0x1d8] sm:$0xff]  ;;  %v630_v9 = vsel %vm55_vm0, %v432_v38, 0.0  ;;  %v142_v59 = vld [vmem:[%s2730_s0 + $0x290] sm:$0xff]  ;;  %v1587_v62 = vmul.f32 %v123_v10, %v123_v10  ;;  %v1593_v3 = vmul.f32 %v127_v26, %v127_v26 }
  0x3b   :  { %2737 = vst [vmem:[#allocation10_spill] sm:$0xff] %v1505_v20  ;;  %v131_v38 = vld [vmem:[%s2730_s0 + $0x238] sm:$0xff]  ;;  %v137_v20 = vld [vmem:[%s2730_s0 + $0x268] sm:$0xff]  ;;  %v1604_v10 = vmul.f32 %v129_v27, %v129_v27 }
  0x3c   :  { %v629_v61 = vadd.f32 %v628_v39, %v627_v31  ;;  %v130_v31 = vld [vmem:[%s2730_s0 + $0x230] sm:$0xff]  ;;  %v133_v39 = vld [vmem:[%s2730_s0 + $0x248] sm:$0xff]  ;;  %2741 = vst [vmem:[#allocation14_spill] sm:$0xff] %v1539_v42 }
  0x3d   :  { %2743 = vst [vmem:[#allocation16_spill] sm:$0xff] %v1570_v57  ;;  %v145_v42 = vld [vmem:[%s2730_s0 + $0x2a8] sm:$0xff]  ;;  %v151_v57 = vld [vmem:[%s2730_s0 + $0x2d8] sm:$0xff] }
  0x3e   :  { %v631_v48 = vadd.f32 %v630_v9, %v629_v61  ;;  %v440_v61 = vmul.f32 %v184_v13, %v184_v13  ;;  %v632_v9 = vsel %vm55_vm0, %v436_v8, 0.0  ;;  %v1572_v13 = vmul.f32 %v119_v1, %v119_v1  ;;  %2745 = vst [vmem:[#allocation18_spill] sm:$0xff] %v1576_v50  ;;  %v150_v50 = vld [vmem:[%s2730_s0 + $0x2d0] sm:$0xff]  ;;  %v157_v27 = vld [vmem:[%s2730_s0 + $0x308] sm:$0xff] }
  0x3f   :  { %v1574_v8 = vmul.f32 %v121_v2, %v121_v2  ;;  %2746 = vst [vmem:[#allocation19_spill] sm:$0xff] %v1587_v62  ;;  %v1589_v1 = vmul.f32 %v125_v11, %v125_v11  ;;  %v1591_v2 = vmul.f32 %v126_v12, %v126_v12  ;;  %v1606_v11 = vmul.f32 %v130_v31, %v130_v31  ;;  %v154_v62 = vld [vmem:[%s2730_s0 + $0x2f0] sm:$0xff] }
  0x40   :  { %2744 = vst [vmem:[#allocation17_spill] sm:$0xff] %v1572_v13  ;;  %v149_v13 = vld [vmem:[%s2730_s0 + $0x2c8] sm:$0xff]  ;;  %v1608_v12 = vmul.f32 %v131_v38, %v131_v38  ;;  %v633_v26 = vadd.f32 %v632_v9, %v631_v48  ;;  %v1622_v31 = vmul.f32 %v133_v39, %v133_v39  ;;  %v1624_v38 = vmul.f32 %v134_v43, %v134_v43  ;;  %v192_v39 = vld [vmem:[%s2730_s0 + $0x420] sm:$0xff] }
  0x41   :  { %2747 = vst [vmem:[#allocation20_spill] sm:$0xff] %v1589_v1  ;;  %v444_v48 = vmul.f32 %v188_v56, %v188_v56  ;;  %v634_v9 = vsel %vm55_vm0, %v440_v61, 0.0  ;;  %v1639_v43 = vmul.f32 %v135_v33, %v135_v33  ;;  %v1641_v56 = vmul.f32 %v137_v20, %v137_v20  ;;  %v163_v1 = vld [vmem:[%s2730_s0 + $0x338] sm:$0xff] }
  0x42   :  { %2748 = vst [vmem:[#allocation21_spill] sm:$0xff] %v1591_v2  ;;  %v155_v2 = vld [vmem:[%s2730_s0 + $0x2f8] sm:$0xff]  ;;  %v1643_v61 = vmul.f32 %v138_v5, %v138_v5  ;;  %v1656_v33 = vmul.f32 %v141_v40, %v141_v40  ;;  %v1658_v20 = vmul.f32 %v142_v59, %v142_v59  ;;  %v1660_v5 = vmul.f32 %v143_v53, %v143_v53 }
  0x43   :  { %2749 = vst [vmem:[#allocation22_spill] sm:$0xff] %v1593_v3  ;;  %v153_v3 = vld [vmem:[%s2730_s0 + $0x2e8] sm:$0xff]  ;;  %v1673_v40 = vmul.f32 %v146_v47, %v146_v47  ;;  %v1675_v59 = vmul.f32 %v147_v35, %v147_v35  ;;  %v1677_v53 = vmul.f32 %v149_v13, %v149_v13  ;;  %v174_v47 = vld [vmem:[%s2730_s0 + $0x390] sm:$0xff]  ;;  %v1691_v35 = vmul.f32 %v150_v50, %v150_v50 }
  0x44   :  { %2750 = vst [vmem:[#allocation23_spill] sm:$0xff] %v1604_v10  ;;  %v161_v10 = vld [vmem:[%s2730_s0 + $0x328] sm:$0xff]  ;;  %v1693_v13 = vmul.f32 %v151_v57, %v151_v57  ;;  %v1707_v50 = vmul.f32 %v154_v62, %v154_v62  ;;  %v1709_v57 = vmul.f32 %v155_v2, %v155_v2 }
  0x45   :  { %2751 = vst [vmem:[#allocation24_spill] sm:$0xff] %v1606_v11  ;;  %v159_v11 = vld [vmem:[%s2730_s0 + $0x318] sm:$0xff]  ;;  %v1726_v2 = vmul.f32 %v161_v10, %v161_v10 }
  0x46   :  { %2752 = vst [vmem:[#allocation25_spill] sm:$0xff] %v1608_v12  ;;  %v158_v12 = vld [vmem:[%s2730_s0 + $0x310] sm:$0xff]  ;;  %v1724_v62 = vmul.f32 %v159_v11, %v159_v11  ;;  %v1741_v11 = vmul.f32 %v165_v44, %v165_v44 }
  0x47   :  { %2753 = vst [vmem:[#allocation26_spill] sm:$0xff] %v1622_v31  ;;  %v162_v31 = vld [vmem:[%s2730_s0 + $0x330] sm:$0xff] }
  0x48   :  { %2754 = vst [vmem:[#allocation27_spill] sm:$0xff] %v1624_v38  ;;  %v1645_v38 = vmul.f32 %v139_v49, %v139_v49  ;;  %v1662_v49 = vmul.f32 %v145_v42, %v145_v42  ;;  %v635_v42 = vadd.f32 %v634_v9, %v633_v26  ;;  %v448_v26 = vmul.f32 %v192_v39, %v192_v39 }
  0x49   :  { %2755 = vst [vmem:[#allocation28_spill] sm:$0xff] %v1639_v43  ;;  %v167_v43 = vld [vmem:[%s2730_s0 + $0x358] sm:$0xff]  ;;  %v636_v9 = vsel %vm55_vm0, %v444_v48, 0.0  ;;  %v1711_v39 = vmul.f32 %v157_v27, %v157_v27  ;;  %v178_v48 = vld [vmem:[%s2730_s0 + $0x3b0] sm:$0xff]  ;;  %v1728_v27 = vmul.f32 %v162_v31, %v162_v31 }
  0x4a   :  { %2756 = vst [vmem:[#allocation29_spill] sm:$0xff] %v1643_v61  ;;  %v169_v61 = vld [vmem:[%s2730_s0 + $0x368] sm:$0xff]  ;;  %v637_v31 = vadd.f32 %v636_v9, %v635_v42  ;;  %v190_v42 = vld [vmem:[%s2730_s0 + $0x410] sm:$0xff]  ;;  %v191_v9 = vld [vmem:[%s2730_s0 + $0x418] sm:$0xff] }
  0x4b   :  { %2757 = vst [vmem:[#allocation30_spill] sm:$0xff] %v1645_v38  ;;  %v166_v38 = vld [vmem:[%s2730_s0 + $0x350] sm:$0xff] }
  0x4c   :  { %2758 = vst [vmem:[#allocation31_spill] sm:$0xff] %v1656_v33  ;;  %v1705_v33 = vmul.f32 %v153_v3, %v153_v3  ;;  %v1722_v3 = vmul.f32 %v158_v12, %v158_v12  ;;  %v1739_v12 = vmul.f32 %v163_v1, %v163_v1  ;;  %v1743_v10 = vmul.f32 %v166_v38, %v166_v38 }
  0x4d   :  { %2759 = vst [vmem:[#allocation32_spill] sm:$0xff] %v1658_v20  ;;  %v171_v20 = vld [vmem:[%s2730_s0 + $0x378] sm:$0xff]  ;;  %v1756_v1 = vmul.f32 %v169_v61, %v169_v61  ;;  %v638_v38 = vsel %vm55_vm0, %v448_v26, 0.0  ;;  %v193_v26 = vld [vmem:[%s2730_s0 + $0x428] sm:$0xff] }
  0x4e   :  { %2760 = vst [vmem:[#allocation33_spill] sm:$0xff] %v1660_v5  ;;  %v170_v5 = vld [vmem:[%s2730_s0 + $0x370] sm:$0xff] }
  0x4f   :  { %2761 = vst [vmem:[#allocation34_spill] sm:$0xff] %v1662_v49  ;;  %v173_v49 = vld [vmem:[%s2730_s0 + $0x388] sm:$0xff] }
  0x50   :  { %2762 = vst [vmem:[#allocation35_spill] sm:$0xff] %v1673_v40  ;;  %v177_v40 = vld [vmem:[%s2730_s0 + $0x3a8] sm:$0xff]  ;;  %v1772_v61 = vmul.f32 %v173_v49, %v173_v49  ;;  %v1789_v49 = vmul.f32 %v178_v48, %v178_v48 }
  0x51   :  { %2763 = vst [vmem:[#allocation36_spill] sm:$0xff] %v1675_v59  ;;  %v175_v59 = vld [vmem:[%s2730_s0 + $0x398] sm:$0xff] }
  0x52   :  { %2764 = vst [vmem:[#allocation37_spill] sm:$0xff] %v1677_v53  ;;  %v196_v53 = vld [vmem:[%s2730_s0 + $0x440] sm:$0xff] }
  0x53   :  { %2765 = vst [vmem:[#allocation38_spill] sm:$0xff] %v1691_v35  ;;  %v181_v35 = vld [vmem:[%s2730_s0 + $0x3c8] sm:$0xff]  ;;  %v452_v44 = vmul.f32 %v196_v53, %v196_v53  ;;  %v1774_v53 = vmul.f32 %v174_v47, %v174_v47 }
  0x54   :  { %2766 = vst [vmem:[#allocation39_spill] sm:$0xff] %v1693_v13  ;;  %v179_v13 = vld [vmem:[%s2730_s0 + $0x3b8] sm:$0xff] }
  0x55   :  { %2767 = vst [vmem:[#allocation40_spill] sm:$0xff] %v1707_v50  ;;  %v183_v50 = vld [vmem:[%s2730_s0 + $0x3d8] sm:$0xff]  ;;  %v1791_v47 = vmul.f32 %v179_v13, %v179_v13  ;;  %v639_v13 = vadd.f32 %v638_v38, %v637_v31  ;;  %v204_v31 = vld [vmem:[%s2730_s0 + $0x480] sm:$0xff]  ;;  %v205_v38 = vld [vmem:[%s2730_s0 + $0x488] sm:$0xff] }
  0x56   :  { %2768 = vst [vmem:[#allocation41_spill] sm:$0xff] %v1709_v57  ;;  %v182_v57 = vld [vmem:[%s2730_s0 + $0x3d0] sm:$0xff]  ;;  %v1806_v48 = vmul.f32 %v183_v50, %v183_v50  ;;  %v640_v50 = vsel %vm55_vm0, %v452_v44, 0.0  ;;  %v207_v44 = vld [vmem:[%s2730_s0 + $0x498] sm:$0xff] }
  0x57   :  { %2769 = vst [vmem:[#allocation42_spill] sm:$0xff] %v1711_v39  ;;  %v185_v39 = vld [vmem:[%s2730_s0 + $0x3e8] sm:$0xff] }
  0x58   :  { %2770 = vst [vmem:[#allocation43_spill] sm:$0xff] %v1722_v3  ;;  %v189_v3 = vld [vmem:[%s2730_s0 + $0x408] sm:$0xff] }
  0x59   :  { %2771 = vst [vmem:[#allocation44_spill] sm:$0xff] %v1724_v62  ;;  %v186_v62 = vld [vmem:[%s2730_s0 + $0x3f0] sm:$0xff] }
  0x5a   :  { %2772 = vst [vmem:[#allocation45_spill] sm:$0xff] %v1726_v2  ;;  %v1754_v2 = vmul.f32 %v167_v43, %v167_v43  ;;  %v1770_v43 = vmul.f32 %v171_v20, %v171_v20  ;;  %v1787_v20 = vmul.f32 %v177_v40, %v177_v40  ;;  %v1804_v40 = vmul.f32 %v182_v57, %v182_v57 }
  0x5b   :  { %2773 = vst [vmem:[#allocation46_spill] sm:$0xff] %v1728_v27  ;;  %v187_v27 = vld [vmem:[%s2730_s0 + $0x3f8] sm:$0xff] }
  0x5c   :  { %2774 = vst [vmem:[#allocation47_spill] sm:$0xff] %v1739_v12  ;;  %v200_v12 = vld [vmem:[%s2730_s0 + $0x460] sm:$0xff] }
  0x5d   :  { %2775 = vst [vmem:[#allocation48_spill] sm:$0xff] %v1743_v10  ;;  %v1768_v10 = vmul.f32 %v170_v5, %v170_v5  ;;  %v1785_v5 = vmul.f32 %v175_v59, %v175_v59  ;;  %v1802_v59 = vmul.f32 %v181_v35, %v181_v35  ;;  %v1819_v35 = vmul.f32 %v186_v62, %v186_v62 }
  0x5e   :  { %2776 = vst [vmem:[#allocation49_spill] sm:$0xff] %v1754_v2  ;;  %v194_v2 = vld [vmem:[%s2730_s0 + $0x430] sm:$0xff]  ;;  %v456_v57 = vmul.f32 %v200_v12, %v200_v12  ;;  %v1835_v62 = vmul.f32 %v190_v42, %v190_v42  ;;  %v1837_v12 = vmul.f32 %v191_v9, %v191_v9 }
  0x5f   :  { %2777 = vst [vmem:[#allocation50_spill] sm:$0xff] %v1756_v1  ;;  %v195_v1 = vld [vmem:[%s2730_s0 + $0x438] sm:$0xff] }
  0x60   :  { %2778 = vst [vmem:[#allocation51_spill] sm:$0xff] %v1768_v10  ;;  %v199_v10 = vld [vmem:[%s2730_s0 + $0x458] sm:$0xff]  ;;  %v1852_v42 = vmul.f32 %v195_v1, %v195_v1 }
  0x61   :  { %2779 = vst [vmem:[#allocation52_spill] sm:$0xff] %v1770_v43  ;;  %v197_v43 = vld [vmem:[%s2730_s0 + $0x448] sm:$0xff] }
  0x62   :  { %2780 = vst [vmem:[#allocation53_spill] sm:$0xff] %v1774_v53  ;;  %v198_v53 = vld [vmem:[%s2730_s0 + $0x450] sm:$0xff]  ;;  %v1854_v9 = vmul.f32 %v197_v43, %v197_v43  ;;  %v641_v43 = vadd.f32 %v640_v50, %v639_v13  ;;  %v1885_v13 = vmul.f32 %v205_v38, %v205_v38 }
  0x63   :  { %2781 = vst [vmem:[#allocation54_spill] sm:$0xff] %v1785_v5  ;;  %v202_v5 = vld [vmem:[%s2730_s0 + $0x470] sm:$0xff] }
  0x64   :  { %2782 = vst [vmem:[#allocation55_spill] sm:$0xff] %v1787_v20  ;;  %v1817_v20 = vmul.f32 %v185_v39, %v185_v39  ;;  %v1833_v39 = vmul.f32 %v189_v3, %v189_v3  ;;  %v1850_v3 = vmul.f32 %v194_v2, %v194_v2  ;;  %v1867_v2 = vmul.f32 %v199_v10, %v199_v10 }
  0x65   :  { %2783 = vst [vmem:[#allocation56_spill] sm:$0xff] %v1789_v49  ;;  %v203_v49 = vld [vmem:[%s2730_s0 + $0x478] sm:$0xff]  ;;  %v460_v10 = vmul.f32 %v204_v31, %v204_v31 }
  0x66   :  { %2784 = vst [vmem:[#allocation57_spill] sm:$0xff] %v1791_v47  ;;  %v201_v47 = vld [vmem:[%s2730_s0 + $0x468] sm:$0xff] }
  0x67   :  { %2785 = vst [vmem:[#allocation58_spill] sm:$0xff] %v1804_v40  ;;  %v1831_v40 = vmul.f32 %v187_v27, %v187_v27  ;;  %v1848_v27 = vmul.f32 %v193_v26, %v193_v26  ;;  %v1865_v26 = vmul.f32 %v198_v53, %v198_v53  ;;  %v1869_v1 = vmul.f32 %v201_v47, %v201_v47 }
  0x68   :  { %2786 = vst [vmem:[#allocation59_spill] sm:$0xff] %v1806_v48  ;;  %v206_v48 = vld [vmem:[%s2730_s0 + $0x490] sm:$0xff]  ;;  %v1882_v53 = vmul.f32 %v203_v49, %v203_v49  ;;  %v642_v47 = vsel %vm55_vm0, %v456_v57, 0.0 }
  0x69   :  { %2787 = vst [vmem:[#allocation60_spill] sm:$0xff] %v1817_v20  ;;  %v209_v20 = vld [vmem:[%s2730_s0 + $0x4a8] sm:$0xff]  ;;  %v1887_v50 = vmul.f32 %v206_v48, %v206_v48  ;;  %v218_v49 = vld [vmem:[%s2730_s0 + $0x4f0] sm:$0xff] }
  0x6a   :  { %2788 = vst [vmem:[#allocation61_spill] sm:$0xff] %v1819_v35  ;;  %v208_v35 = vld [vmem:[%s2730_s0 + $0x4a0] sm:$0xff]  ;;  %v1900_v57 = vmul.f32 %v209_v20, %v209_v20 }
  0x6b   :  { %2789 = vst [vmem:[#allocation62_spill] sm:$0xff] %v1831_v40  ;;  %v211_v40 = vld [vmem:[%s2730_s0 + $0x4b8] sm:$0xff] }
  0x6c   :  { %2790 = vst [vmem:[#allocation63_spill] sm:$0xff] %v1835_v62  ;;  %v212_v62 = vld [vmem:[%s2730_s0 + $0x4c0] sm:$0xff]  ;;  %v1904_v48 = vmul.f32 %v211_v40, %v211_v40  ;;  %v643_v40 = vadd.f32 %v642_v47, %v641_v43  ;;  %v225_v43 = vld [vmem:[%s2730_s0 + $0x528] sm:$0xff] }
  0x6d   :  { %2791 = vst [vmem:[#allocation64_spill] sm:$0xff] %v1837_v12  ;;  %v210_v12 = vld [vmem:[%s2730_s0 + $0x4b0] sm:$0xff]  ;;  %v468_v38 = vmul.f32 %v212_v62, %v212_v62 }
  0x6e   :  { %2792 = vst [vmem:[#allocation65_spill] sm:$0xff] %v1848_v27  ;;  %v1880_v27 = vmul.f32 %v202_v5, %v202_v5  ;;  %v217_v5 = vld [vmem:[%s2730_s0 + $0x4e8] sm:$0xff]  ;;  %v1902_v31 = vmul.f32 %v210_v12, %v210_v12  ;;  %v222_v62 = vld [vmem:[%s2730_s0 + $0x510] sm:$0xff] }
  0x6f   :  { %2793 = vst [vmem:[#allocation66_spill] sm:$0xff] %v1850_v3  ;;  %v214_v3 = vld [vmem:[%s2730_s0 + $0x4d0] sm:$0xff] }
  0x70   :  { %2794 = vst [vmem:[#allocation67_spill] sm:$0xff] %v1852_v42  ;;  %v213_v42 = vld [vmem:[%s2730_s0 + $0x4c8] sm:$0xff]  ;;  %v1917_v20 = vmul.f32 %v214_v3, %v214_v3  ;;  %v701_v3 = vsel %vm55_vm0, %v1348_v7, 0.0  ;;  %v226_v7 = vld [vmem:[%s2730_s0 + $0x530] sm:$0xff] }
  0x71   :  { %2795 = vst [vmem:[#allocation68_spill] sm:$0xff] %v1854_v9  ;;  %v215_v9 = vld [vmem:[%s2730_s0 + $0x4d8] sm:$0xff] }
  0x72   :  { %2796 = vst [vmem:[#allocation69_spill] sm:$0xff] %v1865_v26  ;;  %v464_v26 = vmul.f32 %v208_v35, %v208_v35  ;;  %v219_v35 = vld [vmem:[%s2730_s0 + $0x4f8] sm:$0xff]  ;;  %v1919_v12 = vmul.f32 %v215_v9, %v215_v9  ;;  %v224_v9 = vld [vmem:[%s2730_s0 + $0x520] sm:$0xff] }
  0x73   :  { %2797 = vst [vmem:[#allocation70_spill] sm:$0xff] %v1867_v2  ;;  %v1889_v2 = vmul.f32 %v207_v44, %v207_v44  ;;  %v220_v44 = vld [vmem:[%s2730_s0 + $0x500] sm:$0xff] }
  0x74   :  { %2798 = vst [vmem:[#allocation71_spill] sm:$0xff] %v1869_v1  ;;  %v216_v1 = vld [vmem:[%s2730_s0 + $0x4e0] sm:$0xff] }
  0x75   :  { %2799 = vst [vmem:[#allocation72_spill] sm:$0xff] %v1880_v27  ;;  %v1940_v47 = vmul.f32 %v216_v1, %v216_v1  ;;  %v1955_v27 = vmul.f32 %v219_v35, %v219_v35  ;;  %v1957_v1 = vmul.f32 %v220_v44, %v220_v44  ;;  %v231_v35 = vld [vmem:[%s2730_s0 + $0x558] sm:$0xff] }
  0x76   :  { %2800 = vst [vmem:[#allocation73_spill] sm:$0xff] %v1882_v53  ;;  %v1915_v53 = vmul.f32 %v213_v42, %v213_v42  ;;  %v703_v42 = vsel %vm55_vm0, %v1367_v16, 0.0  ;;  %v227_v16 = vld [vmem:[%s2730_s0 + $0x538] sm:$0xff] }
  0x77   :  { %2801 = vst [vmem:[#allocation74_spill] sm:$0xff] %v1885_v13  ;;  %v1986_v13 = vmul.f32 %v226_v7, %v226_v7 }
  0x78   :  { %2802 = vst [vmem:[#allocation75_spill] sm:$0xff] %v1887_v50  ;;  %v700_v50 = vsel %vm55_vm0, %v1330_v63, 0.0 }
  0x79   :  { %2803 = vst [vmem:[#allocation76_spill] sm:$0xff] %v1889_v2  ;;  %v221_v2 = vld [vmem:[%s2730_s0 + $0x508] sm:$0xff]  ;;  %v702_v63 = vadd.f32 %v701_v3, %v700_v50  ;;  %v705_v50 = vsel %vm55_vm0, %v1382_v22, 0.0  ;;  %v230_v3 = vld [vmem:[%s2730_s0 + $0x550] sm:$0xff]  ;;  %v232_v22 = vld [vmem:[%s2730_s0 + $0x560] sm:$0xff] }
  0x7a   :  { %2804 = vst [vmem:[#allocation77_spill] sm:$0xff] %v1900_v57  ;;  %v707_v57 = vsel %vm55_vm0, %v1397_v28, 0.0  ;;  %v2002_v28 = vmul.f32 %v231_v35, %v231_v35  ;;  %v828_v35 = vsel %vm55_vm0, %v1363_v14, 0.0  ;;  %v240_v14 = vld [vmem:[%s2730_s0 + $0x5a0] sm:$0xff] }
  0x7b   :  { %2805 = vst [vmem:[#allocation78_spill] sm:$0xff] %v1902_v31  ;;  %v644_v31 = vsel %vm55_vm0, %v460_v10, 0.0  ;;  %v1942_v10 = vmul.f32 %v217_v5, %v217_v5  ;;  %v1959_v5 = vmul.f32 %v221_v2, %v221_v2 }
  0x7c   :  { %2806 = vst [vmem:[#allocation79_spill] sm:$0xff] %v1904_v48  ;;  %v223_v48 = vld [vmem:[%s2730_s0 + $0x518] sm:$0xff]  ;;  %v645_v2 = vadd.f32 %v644_v31, %v643_v40  ;;  %v233_v40 = vld [vmem:[%s2730_s0 + $0x568] sm:$0xff] }
  0x7d   :  { %2807 = vst [vmem:[#allocation80_spill] sm:$0xff] %v1915_v53  ;;  %v1974_v44 = vmul.f32 %v223_v48, %v223_v48  ;;  %v646_v53 = vsel %vm55_vm0, %v464_v26, 0.0  ;;  %v2000_v26 = vmul.f32 %v230_v3, %v230_v3  ;;  %v827_v3 = vsel %vm55_vm0, %v1332_v0, 0.0  ;;  %v239_v0 = vld [vmem:[%s2730_s0 + $0x598] sm:$0xff] }
  0x7e   :  { %2808 = vst [vmem:[#allocation81_spill] sm:$0xff] %v1917_v20  ;;  %v228_v20 = vld [vmem:[%s2730_s0 + $0x540] sm:$0xff]  ;;  %v647_v7 = vadd.f32 %v646_v53, %v645_v2  ;;  %v238_v53 = vld [vmem:[%s2730_s0 + $0x590] sm:$0xff] }
  0x7f   :  { %2809 = vst [vmem:[#allocation82_spill] sm:$0xff] %v1919_v12  ;;  %v1944_v12 = vmul.f32 %v218_v49, %v218_v49  ;;  %v229_v49 = vld [vmem:[%s2730_s0 + $0x548] sm:$0xff]  ;;  %v1990_v48 = vmul.f32 %v228_v20, %v228_v20  ;;  %v235_v20 = vld [vmem:[%s2730_s0 + $0x578] sm:$0xff] }
  0x80   :  { %2810 = vst [vmem:[#allocation83_spill] sm:$0xff] %v1942_v10  ;;  %v1981_v10 = vmul.f32 %v225_v43, %v225_v43  ;;  %v709_v43 = vsel %vm55_vm0, %v1415_v36, 0.0  ;;  %v711_v36 = vsel %vm55_vm0, %v1434_v45, 0.0  ;;  %v2039_v45 = vmul.f32 %v235_v20, %v235_v20 }
  0x81   :  { %2811 = vst [vmem:[#allocation84_spill] sm:$0xff] %v1944_v12  ;;  %v704_v12 = vadd.f32 %v703_v42, %v702_v63  ;;  %v234_v42 = vld [vmem:[%s2730_s0 + $0x570] sm:$0xff]  ;;  %v2012_v63 = vmul.f32 %v232_v22, %v232_v22  ;;  %v830_v22 = vsel %vm55_vm0, %v1369_v17, 0.0 }
  0x82   :  { %2812 = vst [vmem:[#allocation85_spill] sm:$0xff] %v1955_v27  ;;  %v1972_v27 = vmul.f32 %v222_v62, %v222_v62  ;;  %v1988_v62 = vmul.f32 %v227_v16, %v227_v16  ;;  %v648_v16 = vsel %vm55_vm0, %v468_v38, 0.0  ;;  %v2031_v38 = vmul.f32 %v234_v42, %v234_v42 }
  0x83   :  { %2813 = vst [vmem:[#allocation86_spill] sm:$0xff] %v1959_v5  ;;  %v1979_v5 = vmul.f32 %v224_v9, %v224_v9  ;;  %v706_v31 = vadd.f32 %v705_v50, %v704_v12  ;;  %v1998_v9 = vmul.f32 %v229_v49, %v229_v49  ;;  %v236_v12 = vld [vmem:[%s2730_s0 + $0x580] sm:$0xff]  ;;  %v237_v49 = vld [vmem:[%s2730_s0 + $0x588] sm:$0xff]  ;;  %v832_v42 = vsel %vm55_vm0, %v1384_v23, 0.0 }
  0x84   :  { %2814 = vst [vmem:[#allocation87_spill] sm:$0xff] %v1974_v44  ;;  %v2041_v17 = vmul.f32 %v236_v12, %v236_v12  ;;  %v649_v20 = vadd.f32 %v648_v16, %v647_v7  ;;  %v650_v23 = vsel %vm55_vm0, %v1940_v47, 0.0  ;;  %v244_v7 = vld [vmem:[%s2730_s0 + $0x5c0] sm:$0xff]  ;;  %v2069_v16 = vmul.f32 %v239_v0, %v239_v0  ;;  %v245_v47 = vld [vmem:[%s2730_s0 + $0x5c8] sm:$0xff]  ;;  %v247_v0 = vld [vmem:[%s2730_s0 + $0x5d8] sm:$0xff] }
  0x85   :  { %2815 = vst [vmem:[#allocation88_spill] sm:$0xff] %v1988_v62  ;;  %v708_v50 = vadd.f32 %v707_v57, %v706_v31  ;;  %v2029_v57 = vmul.f32 %v233_v40, %v233_v40  ;;  %v829_v31 = vadd.f32 %v828_v35, %v827_v3  ;;  %v713_v40 = vsel %vm55_vm0, %v1449_v51, 0.0  ;;  %v243_v51 = vld [vmem:[%s2730_s0 + $0x5b8] sm:$0xff] }
  0x86   :  { %2816 = vst [vmem:[#allocation89_spill] sm:$0xff] %v2002_v28  ;;  %v2053_v3 = vmul.f32 %v237_v49, %v237_v49  ;;  %v715_v28 = vsel %vm55_vm0, %v1455_v54, 0.0  ;;  %v834_v62 = vsel %vm55_vm0, %v1399_v29, 0.0  ;;  %v2071_v49 = vmul.f32 %v240_v14, %v240_v14  ;;  %v246_v54 = vld [vmem:[%s2730_s0 + $0x5d0] sm:$0xff]  ;;  %v248_v14 = vld [vmem:[%s2730_s0 + $0x5e0] sm:$0xff] }
  0x87   :  { %v710_v2 = vadd.f32 %v709_v43, %v708_v50  ;;  %2817 = vst [vmem:[#allocation90_spill] sm:$0xff] %v2039_v45  ;;  %v241_v43 = vld [vmem:[%s2730_s0 + $0x5a8] sm:$0xff]  ;;  %v242_v50 = vld [vmem:[%s2730_s0 + $0x5b0] sm:$0xff]  ;;  %v831_v12 = vadd.f32 %v830_v22, %v829_v31  ;;  %v2058_v45 = vmul.f32 %v238_v53, %v238_v53  ;;  %v836_v31 = vsel %vm55_vm0, %v1417_v37, 0.0 }
  0x88   :  { %2818 = vst [vmem:[#allocation91_spill] sm:$0xff] %v2069_v16  ;;  %v2079_v53 = vmul.f32 %v241_v43, %v241_v43  ;;  %v2081_v29 = vmul.f32 %v242_v50, %v242_v50  ;;  %v719_v37 = vsel %vm55_vm0, %v1501_v18, 0.0  ;;  %v2103_v16 = vmul.f32 %v245_v47, %v245_v47 }
  0x89   :  { %v712_v35 = vadd.f32 %v711_v36, %v710_v2  ;;  %v833_v22 = vadd.f32 %v832_v42, %v831_v12  ;;  %v717_v2 = vsel %vm55_vm0, %v1470_v60, 0.0  ;;  %v651_v42 = vadd.f32 %v650_v23, %v649_v20 }
  0x8a   :  { %v652_v60 = vsel %vm55_vm0, %v1957_v1, 0.0  ;;  %v838_v12 = vsel %vm55_vm0, %v1436_v46, 0.0  ;;  %v2105_v44 = vmul.f32 %v246_v54, %v246_v54  ;;  %v2112_v20 = vmul.f32 %v248_v14, %v248_v14  ;;  %v250_v1 = vld [vmem:[%s2730_s0 + $0x5f0] sm:$0xff] }
  0x8b   :  { %v714_v36 = vadd.f32 %v713_v40, %v712_v35  ;;  %v2093_v40 = vmul.f32 %v243_v51, %v243_v51  ;;  %v835_v50 = vadd.f32 %v834_v62, %v833_v22  ;;  %v2095_v35 = vmul.f32 %v244_v7, %v244_v7  ;;  %v249_v62 = vld [vmem:[%s2730_s0 + $0x5e8] sm:$0xff] }
  0x8c   :  { %v721_v18 = vsel %vm55_vm0, %v1507_v25, 0.0  ;;  %v840_v46 = vsel %vm55_vm0, %v1451_v52, 0.0  ;;  %v653_v23 = vadd.f32 %v652_v60, %v651_v42  ;;  %v654_v7 = vsel %vm55_vm0, %v1979_v5, 0.0 }
  0x8d   :  { %2819 = vst [vmem:[#allocation92_spill] sm:$0xff] %v2093_v40  ;;  %v716_v43 = vadd.f32 %v715_v28, %v714_v36  ;;  %v837_v40 = vadd.f32 %v836_v31, %v835_v50  ;;  %v2110_v28 = vmul.f32 %v247_v0, %v247_v0  ;;  %v723_v47 = vsel %vm55_vm0, %v1522_v34, 0.0  ;;  %v251_v34 = vld [vmem:[%s2730_s0 + $0x5f8] sm:$0xff] }
  0x8e   :  { %v842_v54 = vsel %vm55_vm0, %v1466_v58, 0.0  ;;  %v954_v25 = vsel %vm55_vm0, %v1346_v6, 0.0  ;;  %v955_v52 = vsel %vm55_vm0, %v1365_v15, 0.0  ;;  %v957_v5 = vsel %vm55_vm0, %v1380_v21, 0.0 }
  0x8f   :  { %v718_v51 = vadd.f32 %v717_v2, %v716_v43  ;;  %v839_v22 = vadd.f32 %v838_v12, %v837_v40  ;;  %v2131_v2 = vmul.f32 %v249_v62, %v249_v62  ;;  %v2138_v14 = vmul.f32 %v250_v1, %v250_v1  ;;  %v252_v40 = vld [vmem:[%s2730_s0 + $0x600] sm:$0xff]  ;;  %v254_v1 = vld [vmem:[%s2730_s0 + $0x610] sm:$0xff] }
  0x90   :  { %v725_v58 = vsel %vm55_vm0, %v1537_v41, 0.0  ;;  %v844_v6 = vsel %vm55_vm0, %v1484_v4, 0.0  ;;  %v956_v15 = vadd.f32 %v955_v52, %v954_v25  ;;  %v655_v42 = vadd.f32 %v654_v7, %v653_v23  ;;  %v2822_v25 = vld [vmem:[#allocation12_spill] sm:$0xff] }
  0x91   :  { %v720_v36 = vadd.f32 %v719_v37, %v718_v51  ;;  %v841_v0 = vadd.f32 %v840_v46, %v839_v22  ;;  %v959_v50 = vsel %vm55_vm0, %v1386_v24, 0.0  ;;  %v656_v60 = vsel %vm55_vm0, %v1990_v48, 0.0  ;;  %v253_v24 = vld [vmem:[%s2730_s0 + $0x608] sm:$0xff] }
  0x92   :  { %v727_v41 = vsel %vm55_vm0, %v1555_v55, 0.0  ;;  %v846_v4 = vsel %vm55_vm0, %v1503_v19, 0.0  ;;  %v958_v37 = vadd.f32 %v957_v5, %v956_v15  ;;  %v2155_v12 = vmul.f32 %v251_v34, %v251_v34  ;;  %v2823_v34 = vld [vmem:[#allocation6_spill] sm:$0xff] }
  0x93   :  { %v722_v31 = vadd.f32 %v721_v18, %v720_v36  ;;  %v843_v21 = vadd.f32 %v842_v54, %v841_v0  ;;  %v961_v18 = vsel %vm55_vm0, %v1401_v30, 0.0  ;;  %v2162_v46 = vmul.f32 %v252_v40, %v252_v40  ;;  %v2820_v36 = vld [vmem:[#allocation5_spill] sm:$0xff]  ;;  %v2821_v54 = vld [vmem:[#allocation20_spill] sm:$0xff] }
  0x94   :  { %v729_v55 = vsel %vm55_vm0, %v1574_v8, 0.0  ;;  %v848_v19 = vsel %vm55_vm0, %v1518_v32, 0.0  ;;  %v960_v48 = vadd.f32 %v959_v50, %v958_v37  ;;  %v657_v23 = vadd.f32 %v656_v60, %v655_v42  ;;  %v2825_v42 = vld [vmem:[#allocation14_spill] sm:$0xff]  ;;  %v256_v50 = vld [vmem:[%s2730_s0 + $0x620] sm:$0xff]  ;;  %v2826_v37 = vld [vmem:[#allocation7_spill] sm:$0xff] }
  0x95   :  { %v724_v43 = vadd.f32 %v723_v47, %v722_v31  ;;  %v845_v62 = vadd.f32 %v844_v6, %v843_v21  ;;  %v963_v22 = vsel %vm55_vm0, %v2820_v36, 0.0  ;;  %v658_v47 = vsel %vm55_vm0, %v2012_v63, 0.0  ;;  %v255_v6 = vld [vmem:[%s2730_s0 + $0x618] sm:$0xff]  ;;  %v2824_v63 = vld [vmem:[#allocation23_spill] sm:$0xff] }
  0x96   :  { %v731_v8 = vsel %vm55_vm0, %v2821_v54, 0.0  ;;  %v850_v32 = vsel %vm55_vm0, %v2822_v25, 0.0  ;;  %v962_v52 = vadd.f32 %v961_v18, %v960_v48  ;;  %v2179_v31 = vmul.f32 %v253_v24, %v253_v24  ;;  %v2827_v18 = vld [vmem:[#allocation26_spill] sm:$0xff] }
  0x97   :  { %v726_v51 = vadd.f32 %v725_v58, %v724_v43  ;;  %v847_v30 = vadd.f32 %v846_v4, %v845_v62  ;;  %v965_v58 = vsel %vm55_vm0, %v2823_v34, 0.0  ;;  %v2186_v15 = vmul.f32 %v254_v1, %v254_v1  ;;  %v2830_v54 = vld [vmem:[#allocation18_spill] sm:$0xff]  ;;  %v2831_v34 = vld [vmem:[#allocation9_spill] sm:$0xff] }
  0x98   :  { %v733_v40 = vsel %vm55_vm0, %v2824_v63, 0.0  ;;  %v852_v43 = vsel %vm55_vm0, %v2825_v42, 0.0  ;;  %v964_v21 = vadd.f32 %v963_v22, %v962_v52  ;;  %v659_v60 = vadd.f32 %v658_v47, %v657_v23  ;;  %v2829_v23 = vld [vmem:[#allocation8_spill] sm:$0xff]  ;;  %v257_v22 = vld [vmem:[%s2730_s0 + $0x628] sm:$0xff]  ;;  %v2832_v63 = vld [vmem:[#allocation31_spill] sm:$0xff] }
  0x99   :  { %v728_v7 = vadd.f32 %v727_v41, %v726_v51  ;;  %v849_v5 = vadd.f32 %v848_v19, %v847_v30  ;;  %v967_v51 = vsel %vm55_vm0, %v2826_v37, 0.0  ;;  %v660_v62 = vsel %vm55_vm0, %v2041_v17, 0.0  ;;  %v259_v37 = vld [vmem:[%s2730_s0 + $0x638] sm:$0xff] }
  0x9a   :  { %v735_v24 = vsel %vm55_vm0, %v2827_v18, 0.0  ;;  %v966_v48 = vadd.f32 %v965_v58, %v964_v21  ;;  %v2203_v1 = vmul.f32 %v255_v6, %v255_v6  ;;  %v969_v36 = vsel %vm55_vm0, %v2829_v23, 0.0  ;;  %v2836_v18 = vld [vmem:[#allocation24_spill] sm:$0xff]  ;;  %v2837_v23 = vld [vmem:[#allocation11_spill] sm:$0xff] }
  0x9b   :  { %v730_v0 = vadd.f32 %v729_v55, %v728_v7  ;;  %v851_v4 = vadd.f32 %v850_v32, %v849_v5  ;;  %v2828_v55 = vld [vmem:[#allocation16_spill] sm:$0xff]  ;;  %v2210_v47 = vmul.f32 %v256_v50, %v256_v50  ;;  %v737_v17 = vsel %vm55_vm0, %v1641_v56, 0.0  ;;  %v258_v32 = vld [vmem:[%s2730_s0 + $0x630] sm:$0xff] }
  0x9c   :  { %v854_v19 = vsel %vm55_vm0, %v2828_v55, 0.0  ;;  %v968_v25 = vadd.f32 %v967_v51, %v966_v48  ;;  %v661_v52 = vadd.f32 %v660_v62, %v659_v60  ;;  %v971_v58 = vsel %vm55_vm0, %v2831_v34, 0.0  ;;  %v2834_v60 = vld [vmem:[#allocation10_spill] sm:$0xff] }
  0x9d   :  { %v732_v41 = vadd.f32 %v731_v8, %v730_v0  ;;  %v853_v30 = vadd.f32 %v852_v43, %v851_v4  ;;  %v856_v8 = vsel %vm55_vm0, %v2830_v54, 0.0  ;;  %v662_v6 = vsel %vm55_vm0, %v2071_v49, 0.0  ;;  %v2835_v49 = vld [vmem:[#allocation34_spill] sm:$0xff] }
  0x9e   :  { %v739_v56 = vsel %vm55_vm0, %v2832_v63, 0.0  ;;  %v970_v43 = vadd.f32 %v969_v36, %v968_v25  ;;  %v2227_v21 = vmul.f32 %v257_v22, %v257_v22  ;;  %v973_v4 = vsel %vm55_vm0, %v2834_v60, 0.0 }
  0x9f   :  { %v734_v7 = vadd.f32 %v733_v40, %v732_v41  ;;  %v855_v5 = vadd.f32 %v854_v19, %v853_v30  ;;  %v2833_v40 = vld [vmem:[#allocation21_spill] sm:$0xff]  ;;  %v2234_v51 = vmul.f32 %v258_v32, %v258_v32  ;;  %v741_v62 = vsel %vm55_vm0, %v2835_v49, 0.0 }
  0xa0   :  { %v858_v42 = vsel %vm55_vm0, %v2833_v40, 0.0  ;;  %v972_v55 = vadd.f32 %v971_v58, %v970_v43  ;;  %v260_v19 = vld [vmem:[%s2730_s0 + $0x640] sm:$0xff]  ;;  %v663_v48 = vadd.f32 %v662_v6, %v661_v52  ;;  %v975_v36 = vsel %vm55_vm0, %v2837_v23, 0.0  ;;  %v261_v6 = vld [vmem:[%s2730_s0 + $0x648] sm:$0xff]  ;;  %v262_v43 = vld [vmem:[%s2730_s0 + $0x650] sm:$0xff] }
  0xa1   :  { %v736_v0 = vadd.f32 %v735_v24, %v734_v7  ;;  %v857_v41 = vadd.f32 %v856_v8, %v855_v5  ;;  %v860_v24 = vsel %vm55_vm0, %v2836_v18, 0.0  ;;  %v664_v22 = vsel %vm55_vm0, %v2095_v35, 0.0  ;;  %v2839_v8 = vld [vmem:[#allocation27_spill] sm:$0xff]  ;;  %v2840_v52 = vld [vmem:[#allocation13_spill] sm:$0xff]  ;;  %v2844_v18 = vld [vmem:[#allocation32_spill] sm:$0xff] }
  0xa2   :  { %v862_v25 = vsel %vm55_vm0, %v2839_v8, 0.0  ;;  %v974_v32 = vadd.f32 %v973_v4, %v972_v55  ;;  %v977_v58 = vsel %vm55_vm0, %v2840_v52, 0.0  ;;  %v2258_v63 = vmul.f32 %v260_v19, %v260_v19  ;;  %v2842_v4 = vld [vmem:[#allocation15_spill] sm:$0xff] }
  0xa3   :  { %v738_v50 = vadd.f32 %v737_v17, %v736_v0  ;;  %v859_v30 = vadd.f32 %v858_v42, %v857_v41  ;;  %v2838_v17 = vld [vmem:[#allocation37_spill] sm:$0xff]  ;;  %v2251_v0 = vmul.f32 %v259_v37, %v259_v37  ;;  %v745_v35 = vsel %vm55_vm0, %v1705_v33, 0.0 }
  0xa4   :  { %v743_v54 = vsel %vm55_vm0, %v2838_v17, 0.0  ;;  %v976_v42 = vadd.f32 %v975_v36, %v974_v32  ;;  %v979_v37 = vsel %vm55_vm0, %v2842_v4, 0.0  ;;  %v666_v49 = vsel %vm55_vm0, %v2112_v20, 0.0  ;;  %v263_v36 = vld [vmem:[%s2730_s0 + $0x658] sm:$0xff]  ;;  %v2846_v20 = vld [vmem:[#allocation45_spill] sm:$0xff] }
  0xa5   :  { %v740_v7 = vadd.f32 %v739_v56, %v738_v50  ;;  %v861_v34 = vadd.f32 %v860_v24, %v859_v30  ;;  %v2841_v56 = vld [vmem:[#allocation29_spill] sm:$0xff]  ;;  %v665_v50 = vadd.f32 %v664_v22, %v663_v48  ;;  %v866_v24 = vsel %vm55_vm0, %v2844_v18, 0.0 }
  0xa6   :  { %v864_v40 = vsel %vm55_vm0, %v2841_v56, 0.0  ;;  %v978_v55 = vadd.f32 %v977_v58, %v976_v42  ;;  %v2275_v19 = vmul.f32 %v261_v6, %v261_v6  ;;  %v2845_v48 = vld [vmem:[#allocation17_spill] sm:$0xff]  ;;  %v2282_v22 = vmul.f32 %v262_v43, %v262_v43  ;;  %v2848_v58 = vld [vmem:[#allocation19_spill] sm:$0xff] }
  0xa7   :  { %v742_v5 = vadd.f32 %v741_v62, %v740_v7  ;;  %v863_v60 = vadd.f32 %v862_v25, %v861_v34  ;;  %v2843_v62 = vld [vmem:[#allocation42_spill] sm:$0xff]  ;;  %v981_v23 = vsel %vm55_vm0, %v2845_v48, 0.0  ;;  %v749_v17 = vsel %vm55_vm0, %v2846_v20, 0.0  ;;  %v264_v32 = vld [vmem:[%s2730_s0 + $0x660] sm:$0xff] }
  0xa8   :  { %v747_v33 = vsel %vm55_vm0, %v2843_v62, 0.0  ;;  %v980_v25 = vadd.f32 %v979_v37, %v978_v55  ;;  %v983_v6 = vsel %vm55_vm0, %v2848_v58, 0.0  ;;  %v751_v56 = vsel %vm55_vm0, %v1741_v11, 0.0  ;;  %v2852_v11 = vld [vmem:[#allocation40_spill] sm:$0xff]  ;;  %v266_v55 = vld [vmem:[%s2730_s0 + $0x670] sm:$0xff] }
  0xa9   :  { %v744_v41 = vadd.f32 %v743_v54, %v742_v5  ;;  %v865_v30 = vadd.f32 %v864_v40, %v863_v60  ;;  %v2847_v54 = vld [vmem:[#allocation35_spill] sm:$0xff]  ;;  %v667_v5 = vadd.f32 %v666_v49, %v665_v50  ;;  %v2849_v40 = vld [vmem:[#allocation38_spill] sm:$0xff]  ;;  %v520_v62 = vmul.f32 %v264_v32, %v264_v32 }
  0xaa   :  { %v868_v8 = vsel %vm55_vm0, %v2847_v54, 0.0  ;;  %v870_v42 = vsel %vm55_vm0, %v2849_v40, 0.0  ;;  %v982_v43 = vadd.f32 %v981_v23, %v980_v25  ;;  %v2850_v50 = vld [vmem:[#allocation22_spill] sm:$0xff]  ;;  %v872_v18 = vsel %vm55_vm0, %v2852_v11, 0.0  ;;  %v2853_v23 = vld [vmem:[#allocation25_spill] sm:$0xff]  ;;  %v2854_v54 = vld [vmem:[#allocation43_spill] sm:$0xff] }
  0xab   :  { %v746_v7 = vadd.f32 %v745_v35, %v744_v41  ;;  %v867_v52 = vadd.f32 %v866_v24, %v865_v30  ;;  %v668_v35 = vsel %vm55_vm0, %v2162_v46, 0.0  ;;  %v2299_v41 = vmul.f32 %v263_v36, %v263_v36  ;;  %v265_v49 = vld [vmem:[%s2730_s0 + $0x668] sm:$0xff]  ;;  %v2859_v11 = vld [vmem:[#allocation48_spill] sm:$0xff] }
  0xac   :  { %v985_v37 = vsel %vm55_vm0, %v2850_v50, 0.0  ;;  %v2851_v46 = vld [vmem:[#allocation50_spill] sm:$0xff]  ;;  %v984_v24 = vadd.f32 %v983_v6, %v982_v43  ;;  %v987_v36 = vsel %vm55_vm0, %v2853_v23, 0.0  ;;  %v670_v20 = vsel %vm55_vm0, %v2210_v47, 0.0  ;;  %v267_v6 = vld [vmem:[%s2730_s0 + $0x678] sm:$0xff]  ;;  %v2856_v47 = vld [vmem:[#allocation55_spill] sm:$0xff] }
  0xad   :  { %v748_v34 = vadd.f32 %v747_v33, %v746_v7  ;;  %v869_v4 = vadd.f32 %v868_v8, %v867_v52  ;;  %v753_v33 = vsel %vm55_vm0, %v2851_v46, 0.0  ;;  %v669_v7 = vadd.f32 %v668_v35, %v667_v5  ;;  %v2855_v5 = vld [vmem:[#allocation28_spill] sm:$0xff]  ;;  %v268_v43 = vld [vmem:[%s2730_s0 + $0x680] sm:$0xff] }
  0xae   :  { %v874_v8 = vsel %vm55_vm0, %v2854_v54, 0.0  ;;  %v986_v25 = vadd.f32 %v985_v37, %v984_v24  ;;  %v2321_v32 = vmul.f32 %v265_v49, %v265_v49  ;;  %v989_v58 = vsel %vm55_vm0, %v2855_v5, 0.0  ;;  %v2858_v37 = vld [vmem:[#allocation30_spill] sm:$0xff] }
  0xaf   :  { %v750_v60 = vadd.f32 %v749_v17, %v748_v34  ;;  %v871_v48 = vadd.f32 %v870_v42, %v869_v4  ;;  %v755_v17 = vsel %vm55_vm0, %v1772_v61, 0.0  ;;  %v2328_v35 = vmul.f32 %v266_v55, %v266_v55 }
  0xb0   :  { %v757_v61 = vsel %vm55_vm0, %v2856_v47, 0.0  ;;  %v988_v42 = vadd.f32 %v987_v36, %v986_v25  ;;  %v991_v49 = vsel %vm55_vm0, %v2858_v37, 0.0  ;;  %v672_v46 = vsel %vm55_vm0, %v2258_v63, 0.0  ;;  %v269_v36 = vld [vmem:[%s2730_s0 + $0x688] sm:$0xff]  ;;  %v2861_v63 = vld [vmem:[#allocation60_spill] sm:$0xff]  ;;  %v272_v25 = vld [vmem:[%s2730_s0 + $0x6a0] sm:$0xff] }
  0xb1   :  { %v752_v30 = vadd.f32 %v751_v56, %v750_v60  ;;  %v873_v52 = vadd.f32 %v872_v18, %v871_v48  ;;  %v2857_v56 = vld [vmem:[#allocation46_spill] sm:$0xff]  ;;  %v671_v60 = vadd.f32 %v670_v20, %v669_v7  ;;  %v878_v18 = vsel %vm55_vm0, %v2859_v11, 0.0  ;;  %v2860_v7 = vld [vmem:[#allocation33_spill] sm:$0xff]  ;;  %v2865_v37 = vld [vmem:[#allocation39_spill] sm:$0xff] }
  0xb2   :  { %v876_v40 = vsel %vm55_vm0, %v2857_v56, 0.0  ;;  %v990_v24 = vadd.f32 %v989_v58, %v988_v42  ;;  %v2345_v55 = vmul.f32 %v267_v6, %v267_v6  ;;  %v993_v23 = vsel %vm55_vm0, %v2860_v7, 0.0  ;;  %v2863_v58 = vld [vmem:[#allocation36_spill] sm:$0xff]  ;;  %v2864_v56 = vld [vmem:[#allocation53_spill] sm:$0xff] }
  0xb3   :  { %v754_v34 = vadd.f32 %v753_v33, %v752_v30  ;;  %v875_v50 = vadd.f32 %v874_v8, %v873_v52  ;;  %v759_v33 = vsel %vm55_vm0, %v1802_v59, 0.0  ;;  %v524_v20 = vmul.f32 %v268_v43, %v268_v43  ;;  %v2862_v59 = vld [vmem:[#allocation51_spill] sm:$0xff] }
  0xb4   :  { %v880_v54 = vsel %vm55_vm0, %v2862_v59, 0.0  ;;  %v992_v8 = vadd.f32 %v991_v49, %v990_v24  ;;  %v995_v6 = vsel %vm55_vm0, %v2863_v58, 0.0  ;;  %v674_v47 = vsel %vm55_vm0, %v520_v62, 0.0  ;;  %v270_v49 = vld [vmem:[%s2730_s0 + $0x690] sm:$0xff]  ;;  %v2866_v62 = vld [vmem:[#allocation65_spill] sm:$0xff] }
  0xb5   :  { %v756_v4 = vadd.f32 %v755_v17, %v754_v34  ;;  %v877_v48 = vadd.f32 %v876_v40, %v875_v50  ;;  %v761_v17 = vsel %vm55_vm0, %v2861_v63, 0.0  ;;  %v673_v34 = vadd.f32 %v672_v46, %v671_v60  ;;  %v276_v24 = vld [vmem:[%s2730_s0 + $0x6c0] sm:$0xff] }
  0xb6   :  { %v882_v40 = vsel %vm55_vm0, %v2864_v56, 0.0  ;;  %v994_v42 = vadd.f32 %v993_v23, %v992_v8  ;;  %v2366_v43 = vmul.f32 %v269_v36, %v269_v36  ;;  %v997_v60 = vsel %vm55_vm0, %v2865_v37, 0.0  ;;  %v2868_v23 = vld [vmem:[#allocation41_spill] sm:$0xff] }
  0xb7   :  { %v758_v30 = vadd.f32 %v757_v61, %v756_v4  ;;  %v879_v5 = vadd.f32 %v878_v18, %v877_v48  ;;  %v763_v61 = vsel %vm55_vm0, %v1833_v39, 0.0  ;;  %v528_v46 = vmul.f32 %v272_v25, %v272_v25  ;;  %v2867_v39 = vld [vmem:[#allocation56_spill] sm:$0xff] }
  0xb8   :  { %v884_v11 = vsel %vm55_vm0, %v2867_v39, 0.0  ;;  %v996_v18 = vadd.f32 %v995_v6, %v994_v42  ;;  %v999_v36 = vsel %vm55_vm0, %v2868_v23, 0.0  ;;  %v676_v63 = vsel %vm55_vm0, %v524_v20, 0.0  ;;  %v2871_v6 = vld [vmem:[#allocation44_spill] sm:$0xff]  ;;  %v2872_v20 = vld [vmem:[#allocation71_spill] sm:$0xff] }
  0xb9   :  { %v760_v52 = vadd.f32 %v759_v33, %v758_v30  ;;  %v881_v50 = vadd.f32 %v880_v54, %v879_v5  ;;  %v765_v33 = vsel %vm55_vm0, %v2866_v62, 0.0  ;;  %v675_v30 = vadd.f32 %v674_v47, %v673_v34  ;;  %v2870_v54 = vld [vmem:[#allocation58_spill] sm:$0xff]  ;;  %v271_v47 = vld [vmem:[%s2730_s0 + $0x698] sm:$0xff]  ;;  %v2874_v62 = vld [vmem:[#allocation47_spill] sm:$0xff] }
  0xba   :  { %v886_v8 = vsel %vm55_vm0, %v2870_v54, 0.0  ;;  %v998_v25 = vadd.f32 %v997_v60, %v996_v18  ;;  %v1001_v34 = vsel %vm55_vm0, %v2871_v6, 0.0  ;;  %v769_v56 = vsel %vm55_vm0, %v2872_v20, 0.0  ;;  %v2877_v54 = vld [vmem:[#allocation49_spill] sm:$0xff] }
  0xbb   :  { %v762_v4 = vadd.f32 %v761_v17, %v760_v52  ;;  %v883_v7 = vadd.f32 %v882_v40, %v881_v50  ;;  %v2869_v17 = vld [vmem:[#allocation68_spill] sm:$0xff]  ;;  %v2387_v52 = vmul.f32 %v270_v49, %v270_v49  ;;  %v2873_v40 = vld [vmem:[#allocation61_spill] sm:$0xff]  ;;  %v677_v37 = vadd.f32 %v676_v63, %v675_v30  ;;  %v273_v63 = vld [vmem:[%s2730_s0 + $0x6a8] sm:$0xff] }
  0xbc   :  { %v767_v59 = vsel %vm55_vm0, %v2869_v17, 0.0  ;;  %v888_v42 = vsel %vm55_vm0, %v2873_v40, 0.0  ;;  %v280_v50 = vld [vmem:[%s2730_s0 + $0x6e0] sm:$0xff]  ;;  %v678_v39 = vsel %vm55_vm0, %v528_v46, 0.0  ;;  %v2408_v23 = vmul.f32 %v271_v47, %v271_v47 }
  0xbd   :  { %v764_v48 = vadd.f32 %v763_v61, %v762_v4  ;;  %v885_v58 = vadd.f32 %v884_v11, %v883_v7  ;;  %v532_v61 = vmul.f32 %v276_v24, %v276_v24  ;;  %v1000_v4 = vadd.f32 %v999_v36, %v998_v25  ;;  %v2875_v11 = vld [vmem:[#allocation74_spill] sm:$0xff]  ;;  %v2876_v24 = vld [vmem:[#allocation63_spill] sm:$0xff]  ;;  %v2878_v46 = vld [vmem:[#allocation77_spill] sm:$0xff] }
  0xbe   :  { %v771_v18 = vsel %vm55_vm0, %v2875_v11, 0.0  ;;  %v1005_v30 = vsel %vm55_vm0, %v2877_v54, 0.0  ;;  %v2879_v25 = vld [vmem:[#allocation66_spill] sm:$0xff]  ;;  %v284_v6 = vld [vmem:[%s2730_s0 + $0x700] sm:$0xff] }
  0xbf   :  { %v766_v5 = vadd.f32 %v765_v33, %v764_v48  ;;  %v887_v49 = vadd.f32 %v886_v8, %v885_v58  ;;  %v1003_v33 = vsel %vm55_vm0, %v2874_v62, 0.0  ;;  %v890_v48 = vsel %vm55_vm0, %v2876_v24, 0.0 }
  0xc0   :  { %v1002_v7 = vadd.f32 %v1001_v34, %v1000_v4  ;;  %v773_v8 = vsel %vm55_vm0, %v2878_v46, 0.0  ;;  %v679_v34 = vadd.f32 %v678_v39, %v677_v37  ;;  %v2881_v4 = vld [vmem:[#allocation80_spill] sm:$0xff]  ;;  %v274_v39 = vld [vmem:[%s2730_s0 + $0x6b0] sm:$0xff] }
  0xc1   :  { %v768_v60 = vadd.f32 %v767_v59, %v766_v5  ;;  %v889_v17 = vadd.f32 %v888_v42, %v887_v49  ;;  %v536_v59 = vmul.f32 %v280_v50, %v280_v50  ;;  %v892_v5 = vsel %vm55_vm0, %v2879_v25, 0.0  ;;  %v2886_v25 = vld [vmem:[#allocation57_spill] sm:$0xff] }
  0xc2   :  { %v1004_v58 = vadd.f32 %v1003_v33, %v1002_v7  ;;  %v680_v42 = vsel %vm55_vm0, %v532_v61, 0.0  ;;  %v775_v50 = vsel %vm55_vm0, %v2881_v4, 0.0  ;;  %v2429_v33 = vmul.f32 %v273_v63, %v273_v63  ;;  %v2883_v7 = vld [vmem:[#allocation54_spill] sm:$0xff]  ;;  %v2884_v61 = vld [vmem:[#allocation83_spill] sm:$0xff] }
  0xc3   :  { %v770_v36 = vadd.f32 %v769_v56, %v768_v60  ;;  %v891_v20 = vadd.f32 %v890_v48, %v889_v17  ;;  %v2880_v56 = vld [vmem:[#allocation52_spill] sm:$0xff]  ;;  %v2882_v60 = vld [vmem:[#allocation69_spill] sm:$0xff]  ;;  %v1009_v37 = vsel %vm55_vm0, %v2883_v7, 0.0  ;;  %v777_v48 = vsel %vm55_vm0, %v2884_v61, 0.0  ;;  %v2889_v7 = vld [vmem:[#allocation59_spill] sm:$0xff] }
  0xc4   :  { %v1007_v40 = vsel %vm55_vm0, %v2880_v56, 0.0  ;;  %v894_v49 = vsel %vm55_vm0, %v2882_v60, 0.0  ;;  %v1006_v62 = vadd.f32 %v1005_v30, %v1004_v58  ;;  %v288_v30 = vld [vmem:[%s2730_s0 + $0x720] sm:$0xff]  ;;  %v681_v63 = vadd.f32 %v680_v42, %v679_v34  ;;  %v277_v42 = vld [vmem:[%s2730_s0 + $0x6c8] sm:$0xff] }
  0xc5   :  { %v772_v47 = vadd.f32 %v771_v18, %v770_v36  ;;  %v893_v24 = vadd.f32 %v892_v5, %v891_v20  ;;  %v540_v18 = vmul.f32 %v284_v6, %v284_v6  ;;  %v2885_v36 = vld [vmem:[#allocation72_spill] sm:$0xff]  ;;  %v1011_v5 = vsel %vm55_vm0, %v2886_v25, 0.0  ;;  %v2887_v6 = vld [vmem:[#allocation86_spill] sm:$0xff]  ;;  %v2888_v20 = vld [vmem:[#allocation75_spill] sm:$0xff] }
  0xc6   :  { %v896_v17 = vsel %vm55_vm0, %v2885_v36, 0.0  ;;  %v1008_v54 = vadd.f32 %v1007_v40, %v1006_v62  ;;  %v682_v58 = vsel %vm55_vm0, %v536_v59, 0.0  ;;  %v898_v56 = vsel %vm55_vm0, %v2888_v20, 0.0  ;;  %v2891_v36 = vld [vmem:[#allocation62_spill] sm:$0xff]  ;;  %v2893_v20 = vld [vmem:[#allocation64_spill] sm:$0xff] }
  0xc7   :  { %v774_v11 = vadd.f32 %v773_v8, %v772_v47  ;;  %v895_v8 = vadd.f32 %v894_v49, %v893_v24  ;;  %v779_v47 = vsel %vm55_vm0, %v2887_v6, 0.0  ;;  %v2450_v40 = vmul.f32 %v274_v39, %v274_v39  ;;  %v2890_v49 = vld [vmem:[#allocation78_spill] sm:$0xff] }
  0xc8   :  { %v1010_v4 = vadd.f32 %v1009_v37, %v1008_v54  ;;  %v1013_v34 = vsel %vm55_vm0, %v2889_v7, 0.0  ;;  %v781_v59 = vsel %vm55_vm0, %v1981_v10, 0.0  ;;  %v292_v37 = vld [vmem:[%s2730_s0 + $0x740] sm:$0xff]  ;;  %v683_v39 = vadd.f32 %v682_v58, %v681_v63  ;;  %v278_v58 = vld [vmem:[%s2730_s0 + $0x6d0] sm:$0xff] }
  0xc9   :  { %v776_v46 = vadd.f32 %v775_v50, %v774_v11  ;;  %v897_v62 = vadd.f32 %v896_v17, %v895_v8  ;;  %v544_v50 = vmul.f32 %v288_v30, %v288_v30  ;;  %v900_v11 = vsel %vm55_vm0, %v2890_v49, 0.0  ;;  %v2892_v10 = vld [vmem:[#allocation81_spill] sm:$0xff] }
  0xca   :  { %v1012_v24 = vadd.f32 %v1011_v5, %v1010_v4  ;;  %v1015_v17 = vsel %vm55_vm0, %v2891_v36, 0.0  ;;  %v684_v54 = vsel %vm55_vm0, %v540_v18, 0.0  ;;  %v783_v30 = vsel %vm55_vm0, %v1998_v9, 0.0  ;;  %v2894_v9 = vld [vmem:[#allocation84_spill] sm:$0xff]  ;;  %v2896_v36 = vld [vmem:[#allocation70_spill] sm:$0xff] }
  0xcb   :  { %v778_v60 = vadd.f32 %v777_v48, %v776_v46  ;;  %v899_v48 = vadd.f32 %v898_v56, %v897_v62  ;;  %v902_v46 = vsel %vm55_vm0, %v2892_v10, 0.0  ;;  %v2471_v25 = vmul.f32 %v277_v42, %v277_v42  ;;  %v2895_v42 = vld [vmem:[#allocation67_spill] sm:$0xff] }
  0xcc   :  { %v1014_v8 = vadd.f32 %v1013_v34, %v1012_v24  ;;  %v1017_v63 = vsel %vm55_vm0, %v2893_v20, 0.0  ;;  %v785_v18 = vsel %vm55_vm0, %v2029_v57, 0.0  ;;  %v904_v56 = vsel %vm55_vm0, %v2894_v9, 0.0 }
  0xcd   :  { %v780_v61 = vadd.f32 %v779_v47, %v778_v60  ;;  %v901_v6 = vadd.f32 %v900_v11, %v899_v48  ;;  %v548_v47 = vmul.f32 %v292_v37, %v292_v37  ;;  %v296_v60 = vld [vmem:[%s2730_s0 + $0x760] sm:$0xff]  ;;  %v685_v62 = vadd.f32 %v684_v54, %v683_v39 }
  0xce   :  { %v1016_v4 = vadd.f32 %v1015_v17, %v1014_v8  ;;  %v686_v49 = vsel %vm55_vm0, %v544_v50, 0.0  ;;  %v787_v11 = vsel %vm55_vm0, %v2053_v3, 0.0  ;;  %v906_v57 = vsel %vm55_vm0, %v1972_v27, 0.0  ;;  %v281_v17 = vld [vmem:[%s2730_s0 + $0x6e8] sm:$0xff] }
  0xcf   :  { %v782_v5 = vadd.f32 %v781_v59, %v780_v61  ;;  %v903_v34 = vadd.f32 %v902_v46, %v901_v6  ;;  %v1019_v59 = vsel %vm55_vm0, %v2895_v42, 0.0  ;;  %v2492_v37 = vmul.f32 %v278_v58, %v278_v58 }
  0xd0   :  { %v1018_v24 = vadd.f32 %v1017_v63, %v1016_v4  ;;  %v1021_v39 = vsel %vm55_vm0, %v2896_v36, 0.0  ;;  %v552_v54 = vmul.f32 %v296_v60, %v296_v60  ;;  %v789_v50 = vsel %vm55_vm0, %v2079_v53, 0.0  ;;  %v282_v60 = vld [vmem:[%s2730_s0 + $0x6f0] sm:$0xff] }
  0xd1   :  { %v784_v7 = vadd.f32 %v783_v30, %v782_v5  ;;  %v905_v48 = vadd.f32 %v904_v56, %v903_v34  ;;  %v908_v3 = vsel %vm55_vm0, %v1986_v13, 0.0  ;;  %v300_v30 = vld [vmem:[%s2730_s0 + $0x780] sm:$0xff]  ;;  %v687_v10 = vadd.f32 %v686_v49, %v685_v62  ;;  %v2898_v56 = vld [vmem:[#allocation76_spill] sm:$0xff]  ;;  %v2899_v49 = vld [vmem:[#allocation79_spill] sm:$0xff] }
  0xd2   :  { %v1020_v27 = vadd.f32 %v1019_v59, %v1018_v24  ;;  %v2897_v5 = vld [vmem:[#allocation73_spill] sm:$0xff]  ;;  %v688_v20 = vsel %vm55_vm0, %v548_v47, 0.0  ;;  %v791_v63 = vsel %vm55_vm0, %v2103_v16, 0.0  ;;  %v910_v53 = vsel %vm55_vm0, %v2000_v26, 0.0 }
  0xd3   :  { %v786_v61 = vadd.f32 %v785_v18, %v784_v7  ;;  %v907_v8 = vadd.f32 %v906_v57, %v905_v48  ;;  %v1023_v6 = vsel %vm55_vm0, %v2897_v5, 0.0  ;;  %v2513_v58 = vmul.f32 %v281_v17, %v281_v17  ;;  %v304_v7 = vld [vmem:[%s2730_s0 + $0x7a0] sm:$0xff] }
  0xd4   :  { %v1022_v13 = vadd.f32 %v1021_v39, %v1020_v27  ;;  %v1025_v4 = vsel %vm55_vm0, %v2898_v56, 0.0  ;;  %v556_v62 = vmul.f32 %v300_v30, %v300_v30  ;;  %v793_v47 = vsel %vm55_vm0, %v2131_v2, 0.0  ;;  %v2900_v39 = vld [vmem:[#allocation82_spill] sm:$0xff]  ;;  %v308_v27 = vld [vmem:[%s2730_s0 + $0x7c0] sm:$0xff]  ;;  %v286_v56 = vld [vmem:[%s2730_s0 + $0x710] sm:$0xff] }
  0xd5   :  { %v788_v46 = vadd.f32 %v787_v11, %v786_v61  ;;  %v909_v9 = vadd.f32 %v908_v3, %v907_v8  ;;  %v912_v16 = vsel %vm55_vm0, %v2031_v38, 0.0  ;;  %v689_v34 = vadd.f32 %v688_v20, %v687_v10  ;;  %v2901_v8 = vld [vmem:[#allocation85_spill] sm:$0xff] }
  0xd6   :  { %v1024_v26 = vadd.f32 %v1023_v6, %v1022_v13  ;;  %v1027_v11 = vsel %vm55_vm0, %v2899_v49, 0.0  ;;  %v690_v57 = vsel %vm55_vm0, %v552_v54, 0.0  ;;  %v795_v24 = vsel %vm55_vm0, %v2179_v31, 0.0 }
  0xd7   :  { %v790_v18 = vadd.f32 %v789_v50, %v788_v46  ;;  %v911_v59 = vadd.f32 %v910_v53, %v909_v9  ;;  %v914_v2 = vsel %vm55_vm0, %v2058_v45, 0.0  ;;  %v2534_v61 = vmul.f32 %v282_v60, %v282_v60  ;;  %v285_v50 = vld [vmem:[%s2730_s0 + $0x708] sm:$0xff] }
  0xd8   :  { %v1026_v38 = vadd.f32 %v1025_v4, %v1024_v26  ;;  %v1029_v17 = vsel %vm55_vm0, %v2900_v39, 0.0  ;;  %v560_v3 = vmul.f32 %v304_v7, %v304_v7  ;;  %v797_v54 = vsel %vm55_vm0, %v2227_v21, 0.0  ;;  %v2903_v7 = vld [vmem:[#allocation88_spill] sm:$0xff]  ;;  %v293_v39 = vld [vmem:[%s2730_s0 + $0x748] sm:$0xff] }
  0xd9   :  { %v792_v42 = vadd.f32 %v791_v63, %v790_v18  ;;  %v913_v36 = vadd.f32 %v912_v16, %v911_v59  ;;  %v916_v31 = vsel %vm55_vm0, %v2081_v29, 0.0  ;;  %v691_v30 = vadd.f32 %v690_v57, %v689_v34  ;;  %v2902_v18 = vld [vmem:[#allocation87_spill] sm:$0xff] }
  0xda   :  { %v1028_v45 = vadd.f32 %v1027_v11, %v1026_v38  ;;  %v1031_v5 = vsel %vm55_vm0, %v2901_v8, 0.0  ;;  %v692_v6 = vsel %vm55_vm0, %v556_v62, 0.0  ;;  %v799_v20 = vsel %vm55_vm0, %v2275_v19, 0.0  ;;  %v289_v38 = vld [vmem:[%s2730_s0 + $0x728] sm:$0xff]  ;;  %v2906_v8 = vld [vmem:[#allocation91_spill] sm:$0xff] }
  0xdb   :  { %v794_v48 = vadd.f32 %v793_v47, %v792_v42  ;;  %v915_v46 = vadd.f32 %v914_v2, %v913_v36  ;;  %v918_v21 = vsel %vm55_vm0, %v2105_v44, 0.0  ;;  %v541_v63 = vmul.f32 %v285_v50, %v285_v50  ;;  %v312_v44 = vld [vmem:[%s2730_s0 + $0x7e0] sm:$0xff] }
  0xdc   :  { %v1030_v29 = vadd.f32 %v1029_v17, %v1028_v45  ;;  %v1033_v9 = vsel %vm55_vm0, %v2902_v18, 0.0  ;;  %v564_v4 = vmul.f32 %v308_v27, %v308_v27  ;;  %v801_v60 = vsel %vm55_vm0, %v2321_v32, 0.0 }
  0xdd   :  { %v796_v10 = vadd.f32 %v795_v24, %v794_v48  ;;  %v917_v13 = vadd.f32 %v916_v31, %v915_v46  ;;  %v920_v19 = vsel %vm55_vm0, %v2138_v14, 0.0  ;;  %v693_v47 = vadd.f32 %v692_v6, %v691_v30  ;;  %v2904_v24 = vld [vmem:[#allocation89_spill] sm:$0xff]  ;;  %v290_v6 = vld [vmem:[%s2730_s0 + $0x730] sm:$0xff] }
  0xde   :  { %v1032_v62 = vadd.f32 %v1031_v5, %v1030_v29  ;;  %v1035_v34 = vsel %vm55_vm0, %v2903_v7, 0.0  ;;  %v694_v42 = vsel %vm55_vm0, %v560_v3, 0.0  ;;  %v803_v59 = vsel %vm55_vm0, %v2366_v43, 0.0 }
  0xdf   :  { %v798_v53 = vadd.f32 %v797_v54, %v796_v10  ;;  %v919_v26 = vadd.f32 %v918_v21, %v917_v13  ;;  %v922_v32 = vsel %vm55_vm0, %v2186_v15, 0.0  ;;  %v2574_v49 = vmul.f32 %v286_v56, %v286_v56  ;;  %v2905_v54 = vld [vmem:[#allocation90_spill] sm:$0xff] }
  0xe0   :  { %v1034_v14 = vadd.f32 %v1033_v9, %v1032_v62  ;;  %v1037_v2 = vsel %vm55_vm0, %v2904_v24, 0.0  ;;  %v568_v48 = vmul.f32 %v312_v44, %v312_v44  ;;  %v805_v36 = vsel %vm55_vm0, %v2429_v33, 0.0  ;;  %v2907_v9 = vld [vmem:[#allocation92_spill] sm:$0xff] }
  0xe1   :  { %v800_v16 = vadd.f32 %v799_v20, %v798_v53  ;;  %v921_v57 = vadd.f32 %v920_v19, %v919_v26  ;;  %v924_v43 = vsel %vm55_vm0, %v2234_v51, 0.0  ;;  %v695_v17 = vadd.f32 %v694_v42, %v693_v47  ;;  %v294_v26 = vld [vmem:[%s2730_s0 + $0x750] sm:$0xff]  ;;  %v305_v42 = vld [vmem:[%s2730_s0 + $0x7a8] sm:$0xff] }
  0xe2   :  { %v1036_v15 = vadd.f32 %v1035_v34, %v1034_v14  ;;  %v1039_v31 = vsel %vm55_vm0, %v2905_v54, 0.0  ;;  %v696_v45 = vsel %vm55_vm0, %v564_v4, 0.0  ;;  %v807_v27 = vsel %vm55_vm0, %v2471_v25, 0.0 }
  0xe3   :  { %v802_v11 = vadd.f32 %v801_v60, %v800_v16  ;;  %v923_v3 = vadd.f32 %v922_v32, %v921_v57  ;;  %v926_v33 = vsel %vm55_vm0, %v2282_v22, 0.0  ;;  %v545_v30 = vmul.f32 %v289_v38, %v289_v38  ;;  %v297_v22 = vld [vmem:[%s2730_s0 + $0x768] sm:$0xff] }
  0xe4   :  { %v1038_v51 = vadd.f32 %v1037_v2, %v1036_v15  ;;  %v1041_v5 = vsel %vm55_vm0, %v2906_v8, 0.0  ;;  %v549_v20 = vmul.f32 %v293_v39, %v293_v39  ;;  %v809_v21 = vsel %vm55_vm0, %v2513_v58, 0.0 }
  0xe5   :  { %v804_v50 = vadd.f32 %v803_v59, %v802_v11  ;;  %v925_v46 = vadd.f32 %v924_v43, %v923_v3  ;;  %v928_v25 = vsel %vm55_vm0, %v2328_v35, 0.0  ;;  %v697_v53 = vadd.f32 %v696_v45, %v695_v17  ;;  %v301_v35 = vld [vmem:[%s2730_s0 + $0x788] sm:$0xff] }
  0xe6   :  { %v1040_v29 = vadd.f32 %v1039_v31, %v1038_v51  ;;  %v1043_v56 = vsel %vm55_vm0, %v2907_v9, 0.0  ;;  %v698_v4 = vsel %vm55_vm0, %v568_v48, 0.0  ;;  %v811_v60 = vsel %vm55_vm0, %v541_v63, 0.0  ;;  %v313_v3 = vld [vmem:[%s2730_s0 + $0x7e8] sm:$0xff] }
  0xe7   :  { %v806_v10 = vadd.f32 %v805_v36, %v804_v50  ;;  %v927_v18 = vadd.f32 %v926_v33, %v925_v46  ;;  %v930_v58 = vsel %vm55_vm0, %v2387_v52, 0.0  ;;  %v546_v62 = vmul.f32 %v290_v6, %v290_v6  ;;  %v1081_v50 = vld [vmem:[#allocation2] sm:$0xff]  ;;  %v279_v6 = vld [vmem:[%s2730_s0 + $0x6d8] sm:$0xff] }
  0xe8   :  { %v1042_v19 = vadd.f32 %v1041_v5, %v1040_v29  ;;  %v1045_v16 = vsel %vm55_vm0, %v2110_v28, 0.0  ;;  %v553_v7 = vmul.f32 %v297_v22, %v297_v22  ;;  %v813_v63 = vsel %vm55_vm0, %v545_v30, 0.0  ;;  %v306_v29 = vld [vmem:[%s2730_s0 + $0x7b0] sm:$0xff] }
  0xe9   :  { %v808_v13 = vadd.f32 %v807_v27, %v806_v10  ;;  %v929_v47 = vadd.f32 %v928_v25, %v927_v18  ;;  %v932_v52 = vsel %vm55_vm0, %v2450_v40, 0.0  ;;  %v699_v59 = vadd.f32 %v698_v4, %v697_v53  ;;  %v309_v40 = vld [vmem:[%s2730_s0 + $0x7c8] sm:$0xff]  ;;  %v275_v27 = vld [vmem:[%s2730_s0 + $0x6b8] sm:$0xff]  ;;  %v302_v10 = vld [vmem:[%s2730_s0 + $0x790] sm:$0xff] }
  0xea   :  { %v1044_v34 = vadd.f32 %v1043_v56, %v1042_v19  ;;  %v1047_v28 = vsel %vm55_vm0, %v2155_v12, 0.0  ;;  %v557_v11 = vmul.f32 %v301_v35, %v301_v35  ;;  %v815_v57 = vsel %vm55_vm0, %v549_v20, 0.0  ;;  %v298_v12 = vld [vmem:[%s2730_s0 + $0x770] sm:$0xff]  ;;  %v283_v18 = vld [vmem:[%s2730_s0 + $0x6f8] sm:$0xff] }
  0xeb   :  { %v810_v44 = vadd.f32 %v809_v21, %v808_v13  ;;  %v931_v14 = vadd.f32 %v930_v58, %v929_v47  ;;  %v934_v24 = vsel %vm55_vm0, %v2492_v37, 0.0  ;;  %v550_v38 = vmul.f32 %v294_v26, %v294_v26  ;;  %v310_v58 = vld [vmem:[%s2730_s0 + $0x7d0] sm:$0xff] }
  0xec   :  { %v1046_v2 = vadd.f32 %v1045_v16, %v1044_v34  ;;  %v1049_v43 = vsel %vm55_vm0, %v2203_v1, 0.0  ;;  %v561_v15 = vmul.f32 %v305_v42, %v305_v42  ;;  %v817_v39 = vsel %vm55_vm0, %v553_v7, 0.0 }
  0xed   :  { %v812_v32 = vadd.f32 %v811_v60, %v810_v44  ;;  %v933_v36 = vadd.f32 %v932_v52, %v931_v14  ;;  %v936_v37 = vsel %vm55_vm0, %v2534_v61, 0.0  ;;  %v1051_v1 = vsel %vm55_vm0, %v2251_v0, 0.0  ;;  %v287_v44 = vld [vmem:[%s2730_s0 + $0x718] sm:$0xff] }
  0xee   :  { %v1048_v17 = vadd.f32 %v1047_v28, %v1046_v2  ;;  %v1085_v45 = vadd.f32 %v1081_v50, %v699_v59  ;;  %v565_v33 = vmul.f32 %v309_v40, %v309_v40  ;;  %v819_v51 = vsel %vm55_vm0, %v557_v11, 0.0  ;;  %v1082_v11 = vld [vmem:[#allocation2 + $0x8] sm:$0xff] }
  0xef   :  { %v814_v48 = vadd.f32 %v813_v63, %v812_v32  ;;  %v935_v31 = vadd.f32 %v934_v24, %v933_v36  ;;  %v938_v61 = vsel %vm55_vm0, %v2574_v49, 0.0  ;;  %v554_v46 = vmul.f32 %v298_v12, %v298_v12  ;;  %v314_v63 = vld [vmem:[%s2730_s0 + $0x7f0] sm:$0xff] }
  0xf0   :  { %v1050_v30 = vadd.f32 %v1049_v43, %v1048_v17  ;;  %v1053_v0 = vsel %vm55_vm0, %v2299_v41, 0.0  ;;  %1089 = vst.msk [vmem:[#allocation2] sm:$0xff] %vm55_vm0, %v1085_v45  ;;  %v569_v20 = vmul.f32 %v313_v3, %v313_v3  ;;  %v821_v49 = vsel %vm55_vm0, %v561_v15, 0.0  ;;  %v299_v17 = vld [vmem:[%s2730_s0 + $0x778] sm:$0xff] }
  0xf1   :  { %v816_v54 = vadd.f32 %v815_v57, %v814_v48  ;;  %v937_v5 = vadd.f32 %v936_v37, %v935_v31  ;;  %v940_v21 = vsel %vm55_vm0, %v546_v62, 0.0  ;;  %v531_v22 = vmul.f32 %v275_v27, %v275_v27  ;;  %v303_v45 = vld [vmem:[%s2730_s0 + $0x798] sm:$0xff] }
  0xf2   :  { %v1052_v25 = vadd.f32 %v1051_v1, %v1050_v30  ;;  %v1055_v41 = vsel %vm55_vm0, %v2345_v55, 0.0  ;;  %v558_v9 = vmul.f32 %v302_v10, %v302_v10  ;;  %v823_v56 = vsel %vm55_vm0, %v565_v33, 0.0  ;;  %v307_v10 = vld [vmem:[%s2730_s0 + $0x7b8] sm:$0xff] }
  0xf3   :  { %v818_v8 = vadd.f32 %v817_v39, %v816_v54  ;;  %v939_v13 = vadd.f32 %v938_v61, %v937_v5  ;;  %v942_v4 = vsel %vm55_vm0, %v550_v38, 0.0  ;;  %v535_v19 = vmul.f32 %v279_v6, %v279_v6  ;;  %v295_v38 = vld [vmem:[%s2730_s0 + $0x758] sm:$0xff] }
  0xf4   :  { %v1054_v60 = vadd.f32 %v1053_v0, %v1052_v25  ;;  %v1057_v55 = vsel %vm55_vm0, %v2408_v23, 0.0  ;;  %v562_v47 = vmul.f32 %v306_v29, %v306_v29  ;;  %v825_v16 = vsel %vm55_vm0, %v569_v20, 0.0  ;;  %v291_v23 = vld [vmem:[%s2730_s0 + $0x738] sm:$0xff] }
  0xf5   :  { %v820_v53 = vadd.f32 %v819_v51, %v818_v8  ;;  %v941_v62 = vadd.f32 %v940_v21, %v939_v13  ;;  %v944_v26 = vsel %vm55_vm0, %v554_v46, 0.0  ;;  %v539_v52 = vmul.f32 %v283_v18, %v283_v18  ;;  %v1083_v8 = vld [vmem:[#allocation2 + $0x10] sm:$0xff]  ;;  %v311_v20 = vld [vmem:[%s2730_s0 + $0x7d8] sm:$0xff] }
  0xf6   :  { %v1056_v7 = vadd.f32 %v1055_v41, %v1054_v60  ;;  %v1059_v59 = vsel %vm55_vm0, %v531_v22, 0.0  ;;  %v566_v32 = vmul.f32 %v310_v58, %v310_v58  ;;  %v946_v14 = vsel %vm55_vm0, %v558_v9, 0.0  ;;  %v315_v22 = vld [vmem:[%s2730_s0 + $0x7f8] sm:$0xff] }
  0xf7   :  { %v822_v35 = vadd.f32 %v821_v49, %v820_v53  ;;  %v943_v42 = vadd.f32 %v942_v4, %v941_v62  ;;  %v543_v57 = vmul.f32 %v287_v44, %v287_v44  ;;  %v1061_v40 = vsel %vm55_vm0, %v535_v19, 0.0  ;;  %v1084_v62 = vld [vmem:[#allocation2 + $0x18] sm:$0xff] }
  0xf8   :  { %v1058_v28 = vadd.f32 %v1057_v55, %v1056_v7  ;;  %v570_v48 = vmul.f32 %v314_v63, %v314_v63  ;;  %v948_v36 = vsel %vm55_vm0, %v562_v47, 0.0  ;;  %v547_v12 = vmul.f32 %v291_v23, %v291_v23 }
  0xf9   :  { %v824_v34 = vadd.f32 %v823_v56, %v822_v35  ;;  %v945_v2 = vadd.f32 %v944_v26, %v943_v42  ;;  %v1063_v39 = vsel %vm55_vm0, %v539_v52, 0.0  ;;  %v950_v50 = vsel %vm55_vm0, %v566_v32, 0.0 }
  0xfa   :  { %v1060_v43 = vadd.f32 %v1059_v59, %v1058_v28  ;;  %v551_v54 = vmul.f32 %v295_v38, %v295_v38  ;;  %v1065_v1 = vsel %vm55_vm0, %v543_v57, 0.0  ;;  %v952_v27 = vsel %vm55_vm0, %v570_v48, 0.0 }
  0xfb   :  { %v826_v24 = vadd.f32 %v825_v16, %v824_v34  ;;  %v947_v15 = vadd.f32 %v946_v14, %v945_v2  ;;  %v555_v51 = vmul.f32 %v299_v17, %v299_v17  ;;  %v1067_v30 = vsel %vm55_vm0, %v547_v12, 0.0 }
  0xfc   :  { %v1062_v3 = vadd.f32 %v1061_v40, %v1060_v43  ;;  %v559_v5 = vmul.f32 %v303_v45, %v303_v45  ;;  %v1069_v6 = vsel %vm55_vm0, %v551_v54, 0.0  ;;  %v563_v21 = vmul.f32 %v307_v10, %v307_v10 }
  0xfd   :  { %v1086_v37 = vadd.f32 %v1082_v11, %v826_v24  ;;  %v949_v31 = vadd.f32 %v948_v36, %v947_v15  ;;  %v1071_v25 = vsel %vm55_vm0, %v555_v51, 0.0  ;;  %v567_v13 = vmul.f32 %v311_v20, %v311_v20 }
  0xfe   :  { %v1064_v33 = vadd.f32 %v1063_v39, %v1062_v3  ;;  %v1073_v41 = vsel %vm55_vm0, %v559_v5, 0.0  ;;  %v571_v9 = vmul.f32 %v315_v22, %v315_v22  ;;  %v1075_v56 = vsel %vm55_vm0, %v563_v21, 0.0 }
  0xff   :  { %1090 = vst.msk [vmem:[#allocation2 + $0x8] sm:$0xff] %vm55_vm0, %v1086_v37  ;;  %v951_v61 = vadd.f32 %v950_v50, %v949_v31  ;;  %v1077_v60 = vsel %vm55_vm0, %v567_v13, 0.0 }
 0x100   :  { %v1066_v46 = vadd.f32 %v1065_v1, %v1064_v33  ;;  %v1079_v19 = vsel %vm55_vm0, %v571_v9, 0.0 }
 0x101   :  { %v953_v0 = vadd.f32 %v952_v27, %v951_v61 }
 0x102   :  { %v1068_v49 = vadd.f32 %v1067_v30, %v1066_v46 }
 0x103   :  { %v1087_v29 = vadd.f32 %v1083_v8, %v953_v0 }
 0x104   :  { %v1070_v53 = vadd.f32 %v1069_v6, %v1068_v49 }
 0x105   :  { %1091 = vst.msk [vmem:[#allocation2 + $0x10] sm:$0xff] %vm55_vm0, %v1087_v29 }
 0x106   :  { %v1072_v18 = vadd.f32 %v1071_v25, %v1070_v53 }
 0x108   :  { %v1074_v4 = vadd.f32 %v1073_v41, %v1072_v18 }
 0x10a   :  { %v1076_v58 = vadd.f32 %v1075_v56, %v1074_v4 }
 0x10c   :  { %v1078_v35 = vadd.f32 %v1077_v60, %v1076_v58 }
 0x10e   :  { %v1080_v55 = vadd.f32 %v1079_v19, %v1078_v35 }
 0x110   :  { %v1088_v44 = vadd.f32 %v1084_v62, %v1080_v55 }
 0x112   :  { %1092 = vst.msk [vmem:[#allocation2 + $0x18] sm:$0xff] %vm55_vm0, %v1088_v44 }
 0x113   :  { %1105 = dma.vmem_to_hbm [thread:$0]  %s1098_s26, 512, %s1100_s28, [#allocation3], %s1149_s29, %s1149_s29, %s1150_s30  }
 0x114   :  { %1145 = dma.done.wait [#allocation3], 512  }
 0x115   :  { %1146 = vsyncadd [#allocation3], 4294966784 }
 0x116   :  { %1110 = vsyncpa [#allocation3], 1 }

</bundles_post_ra>
